<compile_context>
chip_gen: v7x
topology: tpu7x:2x2x1
jax: 0.10.0
libtpu: 0.0.40
codegen_flags: <defaults>
</compile_context>

<pallas_src>
import functools

import numpy as np
import jax
import jax.numpy as jnp
from jax.experimental import pallas as pl
from jax.experimental.pallas import tpu as pltpu


STEPS = 3
REDUCTION_RATIO = 16  # forced to 16 in PluginRF.__init__
# 6 ops = (1 + steps) * steps // 2 for steps=3; indices reference previously built states.
GENOTYPE_NORMAL = [
    ("max_pool_3x3", 0),
    ("avg_pool_3x3", 0),
    ("skip_connect", 1),
    ("avg_pool_3x3", 2),
    ("max_pool_3x3", 1),
    ("skip_connect", 3),
]
# 3x3 window taps, fixed order shared by the kernel and the host-side mask builder.
_POOL_OFFSETS = tuple((dh, dw) for dh in (-1, 0, 1) for dw in (-1, 0, 1))


# ---------------- fused PluginRF cell kernel ----------------

def _plugin_rf_kernel(x_ref, wb_ref, w1x1_ref, se1_ref, se2_ref,
                      valid_ref, negb_ref, invc_ref, o_ref, *, W):
    """Fused PluginRF cell for one batch image (channels x flattened HW layout).

    x_ref:     (1, C, HW)      input image
    wb_ref:    (Cb, C)         bottle 1x1 conv weight
    w1x1_ref:  (STEPS, C, Cb)  conv1x1 weight, pre-split along its input channels
    se1_ref:   (Cr, C)         SE fc1 weight
    se2_ref:   (C, Cr)         SE fc2 weight
    valid_ref: (9, HW)         1.0 where the (dh,dw) neighbour is a real pixel
    negb_ref:  (9, HW)         0.0 where valid, -inf where padding (max pool)
    invc_ref:  (1, HW)         1 / (#valid taps)  (avg pool, count_include_pad=False)
    o_ref:     (1, C, HW)
    """
    x = x_ref[0]                                                   # (C, HW)
    HW = x.shape[-1]

    # Pool masks: load once, reuse across all 4 pooling ops in the genotype.
    valid = valid_ref[...]                                         # (9, HW)
    negb = negb_ref[...]                                           # (9, HW)
    inv_cnt = invc_ref[...]                                        # (1, HW)
    valid_rows = [valid[k:k + 1, :] for k in range(9)]
    negb_rows = [negb[k:k + 1, :] for k in range(9)]

    def shifted(y, off):
        # z[:, p] = y[:, p + off] wherever (p + off) is the true spatial neighbour.
        # Wrap-around / cross-row positions are exactly the masked-out ones, so the
        # rotate's wrapped values never contribute.  pltpu.roll follows jnp.roll
        # semantics: roll(y, s)[p] = y[(p - s) mod HW]  =>  s = -off.
        if off == 0:
            return y
        return pltpu.roll(y, shift=(-off) % HW, axis=1)

    def max_pool3x3(y):                                            # MaxPool2d(3,1,1)
        acc = None
        for k, (dh, dw) in enumerate(_POOL_OFFSETS):
            cand = shifted(y, dh * W + dw) + negb_rows[k]          # -inf at padding
            acc = cand if acc is None else jnp.maximum(acc, cand)
        return acc

    def avg_pool3x3(y):                          # AvgPool2d(3,1,1, count_include_pad=False)
        acc = None
        for k, (dh, dw) in enumerate(_POOL_OFFSETS):
            term = shifted(y, dh * W + dw) * valid_rows[k]         # 0 at padding
            acc = term if acc is None else acc + term
        return acc * inv_cnt

    # ---- spatial branch ----
    t = jnp.dot(wb_ref[...], x, preferred_element_type=jnp.float32)   # (Cb, HW)
    states = [t]
    for name, idx in GENOTYPE_NORMAL:
        h = states[idx]
        if name == "skip_connect":
            s = h
        elif name == "avg_pool_3x3":
            s = avg_pool3x3(h)
        else:  # max_pool_3x3
            s = max_pool3x3(h)
        states.append(s)

    # conv1x1(cat(states[-STEPS:])) + x  ==  x + sum_i W_i @ state_i   (no concat buffer)
    acc = x
    for i, st in enumerate(states[-STEPS:]):
        acc = acc + jnp.dot(w1x1_ref[i], st, preferred_element_type=jnp.float32)

    # ---- channel branch: SE (squeeze -> fc -> ReLU -> fc -> sigmoid -> scale) ----
    m = jnp.mean(acc, axis=1, keepdims=True)                       # (C, 1)
    h1 = jnp.maximum(
        jnp.dot(se1_ref[...], m, preferred_element_type=jnp.float32), 0.0)   # (Cr, 1)
    gate = jax.nn.sigmoid(
        jnp.dot(se2_ref[...], h1, preferred_element_type=jnp.float32))       # (C, 1)
    o_ref[0] = acc * gate


# ---------------- host-side constants for roll-based pooling ----------------

def _pool_constants(H, W):
    HW = H * W
    idx = np.arange(HW)
    hh, ww = idx // W, idx % W
    valid = np.stack(
        [((hh + dh >= 0) & (hh + dh < H) & (ww + dw >= 0) & (ww + dw < W))
         for dh, dw in _POOL_OFFSETS]).astype(np.float32)                  # (9, HW)
    negb = np.where(valid > 0.5, 0.0, -np.inf).astype(np.float32)          # (9, HW)
    inv_cnt = (1.0 / valid.sum(axis=0, keepdims=True)).astype(np.float32)  # (1, HW)
    return jnp.asarray(valid), jnp.asarray(negb), jnp.asarray(inv_cnt)


# ---------------- forward ----------------

def plugin_rf_forward(x, params):
    """x: (N, C, H, W) NCHW float32 -> (N, C, H, W)."""
    N, C, H, W = x.shape
    HW = H * W
    Cb = params["bottle_w"].shape[0]
    Cr = params["se_fc1_w"].shape[0]

    x_flat = x.reshape(N, C, HW)
    # conv1x1 weight (C, STEPS*Cb) -> (STEPS, C, Cb): one slice per concatenated state.
    w_split = params["conv1x1_w"].reshape(C, STEPS, Cb).transpose(1, 0, 2)
    valid, negb, inv_cnt = _pool_constants(H, W)

    kernel = functools.partial(_plugin_rf_kernel, W=W)
    bcast = lambda n: (0, 0)

    # TODO(synk): for large feature maps (big C * HW), add an HW grid axis with a
    # 512-2048-lane tile sized to v7x's 64 MiB VMEM; at these shapes one block/batch fits.
    out = pl.pallas_call(
        kernel,
        out_shape=jax.ShapeDtypeStruct((N, C, HW), jnp.float32),
        grid=(N,),
        in_specs=[
            pl.BlockSpec((1, C, HW), lambda n: (n, 0, 0)),        # x (per-image block)
            pl.BlockSpec((Cb, C), bcast),                         # bottle 1x1
            pl.BlockSpec((STEPS, C, Cb), lambda n: (0, 0, 0)),    # conv1x1 (pre-split)
            pl.BlockSpec((Cr, C), bcast),                         # SE fc1
            pl.BlockSpec((C, Cr), bcast),                         # SE fc2
            pl.BlockSpec((9, HW), bcast),                         # pool validity mask
            pl.BlockSpec((9, HW), bcast),                         # pool -inf mask
            pl.BlockSpec((1, HW), bcast),                         # pool 1/count
        ],
        out_specs=pl.BlockSpec((1, C, HW), lambda n: (n, 0, 0)),
        compiler_params=pltpu.CompilerParams(
            dimension_semantics=("parallel",)),                   # batch across TCs (v7x)
    )(x_flat, params["bottle_w"], w_split, params["se_fc1_w"], params["se_fc2_w"],
      valid, negb, inv_cnt)
    return out.reshape(N, C, H, W)


def init_params(key, inplanes, steps=STEPS, reduction_ratio=REDUCTION_RATIO):
    Cb = inplanes // reduction_ratio
    k1, k2, k3, k4 = jax.random.split(key, 4)

    def winit(k, fan_in, shape):
        return jax.random.normal(k, shape, jnp.float32) * (2.0 / fan_in) ** 0.5

    return {
        # Conv2d(inplanes, Cb, 1, bias=False) weight (Cb, inplanes, 1, 1) -> (Cb, inplanes)
        "bottle_w": winit(k1, inplanes, (Cb, inplanes)),
        # Conv2d(Cb*steps, inplanes, 1, bias=False) -> (inplanes, Cb*steps)
        "conv1x1_w": winit(k2, Cb * steps, (inplanes, Cb * steps)),
        # SE: Linear(inplanes, inplanes//16, bias=False), Linear(inplanes//16, inplanes, bias=False)
        "se_fc1_w": winit(k3, inplanes, (inplanes // reduction_ratio, inplanes)),
        "se_fc2_w": winit(k4, inplanes // reduction_ratio,
                          (inplanes, inplanes // reduction_ratio)),
    }


if __name__ == "__main__":
    key = jax.random.PRNGKey(0)
    kx, kp = jax.random.split(key)
    # inplanes must be divisible by reduction_ratio=16 -> use 64 channels; HW = 256 lanes.
    N, C, H, W = 2, 64, 16, 16
    x = jax.random.normal(kx, (N, C, H, W), jnp.float32)
    params = init_params(kp, C)

    out = jax.jit(plugin_rf_forward)(x, params)
    out = jax.block_until_ready(out)
    assert out.shape == (N, C, H, W) and out.dtype == jnp.float32
    assert bool(jnp.all(jnp.isfinite(out)))
    print("KERNEL_OK")
</pallas_src>

<mosaic_0001>
module attributes {stable_mosaic.version = 11 : i64} {
  func.func @_plugin_rf_kernel(%arg0: i32, %arg1: memref<1x64x256xf32, #tpu.memory_space<vmem>>, %arg2: memref<4x64xf32, #tpu.memory_space<vmem>>, %arg3: memref<3x64x4xf32, #tpu.memory_space<vmem>>, %arg4: memref<4x64xf32, #tpu.memory_space<vmem>>, %arg5: memref<64x4xf32, #tpu.memory_space<vmem>>, %arg6: memref<9x256xf32, #tpu.memory_space<vmem>>, %arg7: memref<9x256xf32, #tpu.memory_space<vmem>>, %arg8: memref<1x256xf32, #tpu.memory_space<vmem>>, %arg9: memref<1x64x256xf32, #tpu.memory_space<vmem>>) attributes {dimension_semantics = [#tpu.dimension_semantics<parallel>], iteration_bounds = array<i64: 2>, scalar_prefetch = 0 : i64, scratch_operands = 0 : i64, tpu.core_type = #tpu.core_type<tc>, window_params = [{transform_indices = @transform_0, window_bounds = array<i64: 1, 64, 256>}, {pipeline_mode = #tpu.pipeline_mode<synchronous>, transform_indices = @transform_1, window_bounds = array<i64: 4, 64>}, {pipeline_mode = #tpu.pipeline_mode<synchronous>, transform_indices = @transform_2, window_bounds = array<i64: 3, 64, 4>}, {pipeline_mode = #tpu.pipeline_mode<synchronous>, transform_indices = @transform_3, window_bounds = array<i64: 4, 64>}, {pipeline_mode = #tpu.pipeline_mode<synchronous>, transform_indices = @transform_4, window_bounds = array<i64: 64, 4>}, {pipeline_mode = #tpu.pipeline_mode<synchronous>, transform_indices = @transform_5, window_bounds = array<i64: 9, 256>}, {pipeline_mode = #tpu.pipeline_mode<synchronous>, transform_indices = @transform_6, window_bounds = array<i64: 9, 256>}, {pipeline_mode = #tpu.pipeline_mode<synchronous>, transform_indices = @transform_7, window_bounds = array<i64: 1, 256>}, {transform_indices = @transform_8, window_bounds = array<i64: 1, 64, 256>}]} {
    %c0 = arith.constant 0 : index
    %c0_0 = arith.constant 0 : index
    %c0_1 = arith.constant 0 : index
    %0 = vector.load %arg1[%c0, %c0_0, %c0_1] : memref<1x64x256xf32, #tpu.memory_space<vmem>>, vector<1x64x256xf32>
    %1 = vector.shape_cast %0 : vector<1x64x256xf32> to vector<64x256xf32>
    %c0_2 = arith.constant 0 : index
    %c0_3 = arith.constant 0 : index
    %2 = vector.load %arg6[%c0_2, %c0_3] : memref<9x256xf32, #tpu.memory_space<vmem>>, vector<9x256xf32>
    %c0_4 = arith.constant 0 : index
    %c0_5 = arith.constant 0 : index
    %3 = vector.load %arg7[%c0_4, %c0_5] : memref<9x256xf32, #tpu.memory_space<vmem>>, vector<9x256xf32>
    %c0_6 = arith.constant 0 : index
    %c0_7 = arith.constant 0 : index
    %4 = vector.load %arg8[%c0_6, %c0_7] : memref<1x256xf32, #tpu.memory_space<vmem>>, vector<1x256xf32>
    %5 = vector.extract_strided_slice %2 {offsets = [0, 0], sizes = [1, 256], strides = [1, 1]} : vector<9x256xf32> to vector<1x256xf32>
    %6 = vector.extract_strided_slice %2 {offsets = [1, 0], sizes = [1, 256], strides = [1, 1]} : vector<9x256xf32> to vector<1x256xf32>
    %7 = vector.extract_strided_slice %2 {offsets = [2, 0], sizes = [1, 256], strides = [1, 1]} : vector<9x256xf32> to vector<1x256xf32>
    %8 = vector.extract_strided_slice %2 {offsets = [3, 0], sizes = [1, 256], strides = [1, 1]} : vector<9x256xf32> to vector<1x256xf32>
    %9 = vector.extract_strided_slice %2 {offsets = [4, 0], sizes = [1, 256], strides = [1, 1]} : vector<9x256xf32> to vector<1x256xf32>
    %10 = vector.extract_strided_slice %2 {offsets = [5, 0], sizes = [1, 256], strides = [1, 1]} : vector<9x256xf32> to vector<1x256xf32>
    %11 = vector.extract_strided_slice %2 {offsets = [6, 0], sizes = [1, 256], strides = [1, 1]} : vector<9x256xf32> to vector<1x256xf32>
    %12 = vector.extract_strided_slice %2 {offsets = [7, 0], sizes = [1, 256], strides = [1, 1]} : vector<9x256xf32> to vector<1x256xf32>
    %13 = vector.extract_strided_slice %2 {offsets = [8, 0], sizes = [1, 256], strides = [1, 1]} : vector<9x256xf32> to vector<1x256xf32>
    %14 = vector.extract_strided_slice %3 {offsets = [0, 0], sizes = [1, 256], strides = [1, 1]} : vector<9x256xf32> to vector<1x256xf32>
    %15 = vector.extract_strided_slice %3 {offsets = [1, 0], sizes = [1, 256], strides = [1, 1]} : vector<9x256xf32> to vector<1x256xf32>
    %16 = vector.extract_strided_slice %3 {offsets = [2, 0], sizes = [1, 256], strides = [1, 1]} : vector<9x256xf32> to vector<1x256xf32>
    %17 = vector.extract_strided_slice %3 {offsets = [3, 0], sizes = [1, 256], strides = [1, 1]} : vector<9x256xf32> to vector<1x256xf32>
    %18 = vector.extract_strided_slice %3 {offsets = [4, 0], sizes = [1, 256], strides = [1, 1]} : vector<9x256xf32> to vector<1x256xf32>
    %19 = vector.extract_strided_slice %3 {offsets = [5, 0], sizes = [1, 256], strides = [1, 1]} : vector<9x256xf32> to vector<1x256xf32>
    %20 = vector.extract_strided_slice %3 {offsets = [6, 0], sizes = [1, 256], strides = [1, 1]} : vector<9x256xf32> to vector<1x256xf32>
    %21 = vector.extract_strided_slice %3 {offsets = [7, 0], sizes = [1, 256], strides = [1, 1]} : vector<9x256xf32> to vector<1x256xf32>
    %22 = vector.extract_strided_slice %3 {offsets = [8, 0], sizes = [1, 256], strides = [1, 1]} : vector<9x256xf32> to vector<1x256xf32>
    %c0_8 = arith.constant 0 : index
    %c0_9 = arith.constant 0 : index
    %23 = vector.load %arg2[%c0_8, %c0_9] : memref<4x64xf32, #tpu.memory_space<vmem>>, vector<4x64xf32>
    %cst = arith.constant dense<0.000000e+00> : vector<4x256xf32>
    %24 = tpu.matmul %23, %1, %cst {dimension_numbers = #tpu.dot_dimension_numbers<[1], [0], [0], [1], [0, 0, 1, 1], [], []>} : vector<4x64xf32>, vector<64x256xf32>, vector<4x256xf32> -> vector<4x256xf32>
    %c17_i32 = arith.constant 17 : i32
    %25 = tpu.dynamic_rotate %24 by %c17_i32 dim 1 : vector<4x256xf32>, i32 -> vector<4x256xf32>
    %26 = vector.broadcast %14 : vector<1x256xf32> to vector<4x256xf32>
    %27 = arith.addf %25, %26 : vector<4x256xf32>
    %c16_i32 = arith.constant 16 : i32
    %28 = tpu.dynamic_rotate %24 by %c16_i32 dim 1 : vector<4x256xf32>, i32 -> vector<4x256xf32>
    %29 = vector.broadcast %15 : vector<1x256xf32> to vector<4x256xf32>
    %30 = arith.addf %28, %29 : vector<4x256xf32>
    %31 = arith.maximumf %27, %30 : vector<4x256xf32>
    %c15_i32 = arith.constant 15 : i32
    %32 = tpu.dynamic_rotate %24 by %c15_i32 dim 1 : vector<4x256xf32>, i32 -> vector<4x256xf32>
    %33 = vector.broadcast %16 : vector<1x256xf32> to vector<4x256xf32>
    %34 = arith.addf %32, %33 : vector<4x256xf32>
    %35 = arith.maximumf %31, %34 : vector<4x256xf32>
    %c1_i32 = arith.constant 1 : i32
    %36 = tpu.dynamic_rotate %24 by %c1_i32 dim 1 : vector<4x256xf32>, i32 -> vector<4x256xf32>
    %37 = vector.broadcast %17 : vector<1x256xf32> to vector<4x256xf32>
    %38 = arith.addf %36, %37 : vector<4x256xf32>
    %39 = arith.maximumf %35, %38 : vector<4x256xf32>
    %40 = vector.broadcast %18 : vector<1x256xf32> to vector<4x256xf32>
    %41 = arith.addf %24, %40 : vector<4x256xf32>
    %42 = arith.maximumf %39, %41 : vector<4x256xf32>
    %c255_i32 = arith.constant 255 : i32
    %43 = tpu.dynamic_rotate %24 by %c255_i32 dim 1 : vector<4x256xf32>, i32 -> vector<4x256xf32>
    %44 = vector.broadcast %19 : vector<1x256xf32> to vector<4x256xf32>
    %45 = arith.addf %43, %44 : vector<4x256xf32>
    %46 = arith.maximumf %42, %45 : vector<4x256xf32>
    %c241_i32 = arith.constant 241 : i32
    %47 = tpu.dynamic_rotate %24 by %c241_i32 dim 1 : vector<4x256xf32>, i32 -> vector<4x256xf32>
    %48 = vector.broadcast %20 : vector<1x256xf32> to vector<4x256xf32>
    %49 = arith.addf %47, %48 : vector<4x256xf32>
    %50 = arith.maximumf %46, %49 : vector<4x256xf32>
    %c240_i32 = arith.constant 240 : i32
    %51 = tpu.dynamic_rotate %24 by %c240_i32 dim 1 : vector<4x256xf32>, i32 -> vector<4x256xf32>
    %52 = vector.broadcast %21 : vector<1x256xf32> to vector<4x256xf32>
    %53 = arith.addf %51, %52 : vector<4x256xf32>
    %54 = arith.maximumf %50, %53 : vector<4x256xf32>
    %c239_i32 = arith.constant 239 : i32
    %55 = tpu.dynamic_rotate %24 by %c239_i32 dim 1 : vector<4x256xf32>, i32 -> vector<4x256xf32>
    %56 = vector.broadcast %22 : vector<1x256xf32> to vector<4x256xf32>
    %57 = arith.addf %55, %56 : vector<4x256xf32>
    %58 = arith.maximumf %54, %57 : vector<4x256xf32>
    %c17_i32_10 = arith.constant 17 : i32
    %59 = tpu.dynamic_rotate %24 by %c17_i32_10 dim 1 : vector<4x256xf32>, i32 -> vector<4x256xf32>
    %60 = vector.broadcast %5 : vector<1x256xf32> to vector<4x256xf32>
    %61 = arith.mulf %59, %60 : vector<4x256xf32>
    %c16_i32_11 = arith.constant 16 : i32
    %62 = tpu.dynamic_rotate %24 by %c16_i32_11 dim 1 : vector<4x256xf32>, i32 -> vector<4x256xf32>
    %63 = vector.broadcast %6 : vector<1x256xf32> to vector<4x256xf32>
    %64 = arith.mulf %62, %63 : vector<4x256xf32>
    %65 = arith.addf %61, %64 : vector<4x256xf32>
    %c15_i32_12 = arith.constant 15 : i32
    %66 = tpu.dynamic_rotate %24 by %c15_i32_12 dim 1 : vector<4x256xf32>, i32 -> vector<4x256xf32>
    %67 = vector.broadcast %7 : vector<1x256xf32> to vector<4x256xf32>
    %68 = arith.mulf %66, %67 : vector<4x256xf32>
    %69 = arith.addf %65, %68 : vector<4x256xf32>
    %c1_i32_13 = arith.constant 1 : i32
    %70 = tpu.dynamic_rotate %24 by %c1_i32_13 dim 1 : vector<4x256xf32>, i32 -> vector<4x256xf32>
    %71 = vector.broadcast %8 : vector<1x256xf32> to vector<4x256xf32>
    %72 = arith.mulf %70, %71 : vector<4x256xf32>
    %73 = arith.addf %69, %72 : vector<4x256xf32>
    %74 = vector.broadcast %9 : vector<1x256xf32> to vector<4x256xf32>
    %75 = arith.mulf %24, %74 : vector<4x256xf32>
    %76 = arith.addf %73, %75 : vector<4x256xf32>
    %c255_i32_14 = arith.constant 255 : i32
    %77 = tpu.dynamic_rotate %24 by %c255_i32_14 dim 1 : vector<4x256xf32>, i32 -> vector<4x256xf32>
    %78 = vector.broadcast %10 : vector<1x256xf32> to vector<4x256xf32>
    %79 = arith.mulf %77, %78 : vector<4x256xf32>
    %80 = arith.addf %76, %79 : vector<4x256xf32>
    %c241_i32_15 = arith.constant 241 : i32
    %81 = tpu.dynamic_rotate %24 by %c241_i32_15 dim 1 : vector<4x256xf32>, i32 -> vector<4x256xf32>
    %82 = vector.broadcast %11 : vector<1x256xf32> to vector<4x256xf32>
    %83 = arith.mulf %81, %82 : vector<4x256xf32>
    %84 = arith.addf %80, %83 : vector<4x256xf32>
    %c240_i32_16 = arith.constant 240 : i32
    %85 = tpu.dynamic_rotate %24 by %c240_i32_16 dim 1 : vector<4x256xf32>, i32 -> vector<4x256xf32>
    %86 = vector.broadcast %12 : vector<1x256xf32> to vector<4x256xf32>
    %87 = arith.mulf %85, %86 : vector<4x256xf32>
    %88 = arith.addf %84, %87 : vector<4x256xf32>
    %c239_i32_17 = arith.constant 239 : i32
    %89 = tpu.dynamic_rotate %24 by %c239_i32_17 dim 1 : vector<4x256xf32>, i32 -> vector<4x256xf32>
    %90 = vector.broadcast %13 : vector<1x256xf32> to vector<4x256xf32>
    %91 = arith.mulf %89, %90 : vector<4x256xf32>
    %92 = arith.addf %88, %91 : vector<4x256xf32>
    %93 = vector.broadcast %4 : vector<1x256xf32> to vector<4x256xf32>
    %94 = arith.mulf %92, %93 : vector<4x256xf32>
    %c17_i32_18 = arith.constant 17 : i32
    %95 = tpu.dynamic_rotate %94 by %c17_i32_18 dim 1 : vector<4x256xf32>, i32 -> vector<4x256xf32>
    %96 = vector.broadcast %5 : vector<1x256xf32> to vector<4x256xf32>
    %97 = arith.mulf %95, %96 : vector<4x256xf32>
    %c16_i32_19 = arith.constant 16 : i32
    %98 = tpu.dynamic_rotate %94 by %c16_i32_19 dim 1 : vector<4x256xf32>, i32 -> vector<4x256xf32>
    %99 = vector.broadcast %6 : vector<1x256xf32> to vector<4x256xf32>
    %100 = arith.mulf %98, %99 : vector<4x256xf32>
    %101 = arith.addf %97, %100 : vector<4x256xf32>
    %c15_i32_20 = arith.constant 15 : i32
    %102 = tpu.dynamic_rotate %94 by %c15_i32_20 dim 1 : vector<4x256xf32>, i32 -> vector<4x256xf32>
    %103 = vector.broadcast %7 : vector<1x256xf32> to vector<4x256xf32>
    %104 = arith.mulf %102, %103 : vector<4x256xf32>
    %105 = arith.addf %101, %104 : vector<4x256xf32>
    %c1_i32_21 = arith.constant 1 : i32
    %106 = tpu.dynamic_rotate %94 by %c1_i32_21 dim 1 : vector<4x256xf32>, i32 -> vector<4x256xf32>
    %107 = vector.broadcast %8 : vector<1x256xf32> to vector<4x256xf32>
    %108 = arith.mulf %106, %107 : vector<4x256xf32>
    %109 = arith.addf %105, %108 : vector<4x256xf32>
    %110 = vector.broadcast %9 : vector<1x256xf32> to vector<4x256xf32>
    %111 = arith.mulf %94, %110 : vector<4x256xf32>
    %112 = arith.addf %109, %111 : vector<4x256xf32>
    %c255_i32_22 = arith.constant 255 : i32
    %113 = tpu.dynamic_rotate %94 by %c255_i32_22 dim 1 : vector<4x256xf32>, i32 -> vector<4x256xf32>
    %114 = vector.broadcast %10 : vector<1x256xf32> to vector<4x256xf32>
    %115 = arith.mulf %113, %114 : vector<4x256xf32>
    %116 = arith.addf %112, %115 : vector<4x256xf32>
    %c241_i32_23 = arith.constant 241 : i32
    %117 = tpu.dynamic_rotate %94 by %c241_i32_23 dim 1 : vector<4x256xf32>, i32 -> vector<4x256xf32>
    %118 = vector.broadcast %11 : vector<1x256xf32> to vector<4x256xf32>
    %119 = arith.mulf %117, %118 : vector<4x256xf32>
    %120 = arith.addf %116, %119 : vector<4x256xf32>
    %c240_i32_24 = arith.constant 240 : i32
    %121 = tpu.dynamic_rotate %94 by %c240_i32_24 dim 1 : vector<4x256xf32>, i32 -> vector<4x256xf32>
    %122 = vector.broadcast %12 : vector<1x256xf32> to vector<4x256xf32>
    %123 = arith.mulf %121, %122 : vector<4x256xf32>
    %124 = arith.addf %120, %123 : vector<4x256xf32>
    %c239_i32_25 = arith.constant 239 : i32
    %125 = tpu.dynamic_rotate %94 by %c239_i32_25 dim 1 : vector<4x256xf32>, i32 -> vector<4x256xf32>
    %126 = vector.broadcast %13 : vector<1x256xf32> to vector<4x256xf32>
    %127 = arith.mulf %125, %126 : vector<4x256xf32>
    %128 = arith.addf %124, %127 : vector<4x256xf32>
    %129 = vector.broadcast %4 : vector<1x256xf32> to vector<4x256xf32>
    %130 = arith.mulf %128, %129 : vector<4x256xf32>
    %c17_i32_26 = arith.constant 17 : i32
    %131 = tpu.dynamic_rotate %58 by %c17_i32_26 dim 1 : vector<4x256xf32>, i32 -> vector<4x256xf32>
    %132 = vector.broadcast %14 : vector<1x256xf32> to vector<4x256xf32>
    %133 = arith.addf %131, %132 : vector<4x256xf32>
    %c16_i32_27 = arith.constant 16 : i32
    %134 = tpu.dynamic_rotate %58 by %c16_i32_27 dim 1 : vector<4x256xf32>, i32 -> vector<4x256xf32>
    %135 = vector.broadcast %15 : vector<1x256xf32> to vector<4x256xf32>
    %136 = arith.addf %134, %135 : vector<4x256xf32>
    %137 = arith.maximumf %133, %136 : vector<4x256xf32>
    %c15_i32_28 = arith.constant 15 : i32
    %138 = tpu.dynamic_rotate %58 by %c15_i32_28 dim 1 : vector<4x256xf32>, i32 -> vector<4x256xf32>
    %139 = vector.broadcast %16 : vector<1x256xf32> to vector<4x256xf32>
    %140 = arith.addf %138, %139 : vector<4x256xf32>
    %141 = arith.maximumf %137, %140 : vector<4x256xf32>
    %c1_i32_29 = arith.constant 1 : i32
    %142 = tpu.dynamic_rotate %58 by %c1_i32_29 dim 1 : vector<4x256xf32>, i32 -> vector<4x256xf32>
    %143 = vector.broadcast %17 : vector<1x256xf32> to vector<4x256xf32>
    %144 = arith.addf %142, %143 : vector<4x256xf32>
    %145 = arith.maximumf %141, %144 : vector<4x256xf32>
    %146 = vector.broadcast %18 : vector<1x256xf32> to vector<4x256xf32>
    %147 = arith.addf %58, %146 : vector<4x256xf32>
    %148 = arith.maximumf %145, %147 : vector<4x256xf32>
    %c255_i32_30 = arith.constant 255 : i32
    %149 = tpu.dynamic_rotate %58 by %c255_i32_30 dim 1 : vector<4x256xf32>, i32 -> vector<4x256xf32>
    %150 = vector.broadcast %19 : vector<1x256xf32> to vector<4x256xf32>
    %151 = arith.addf %149, %150 : vector<4x256xf32>
    %152 = arith.maximumf %148, %151 : vector<4x256xf32>
    %c241_i32_31 = arith.constant 241 : i32
    %153 = tpu.dynamic_rotate %58 by %c241_i32_31 dim 1 : vector<4x256xf32>, i32 -> vector<4x256xf32>
    %154 = vector.broadcast %20 : vector<1x256xf32> to vector<4x256xf32>
    %155 = arith.addf %153, %154 : vector<4x256xf32>
    %156 = arith.maximumf %152, %155 : vector<4x256xf32>
    %c240_i32_32 = arith.constant 240 : i32
    %157 = tpu.dynamic_rotate %58 by %c240_i32_32 dim 1 : vector<4x256xf32>, i32 -> vector<4x256xf32>
    %158 = vector.broadcast %21 : vector<1x256xf32> to vector<4x256xf32>
    %159 = arith.addf %157, %158 : vector<4x256xf32>
    %160 = arith.maximumf %156, %159 : vector<4x256xf32>
    %c239_i32_33 = arith.constant 239 : i32
    %161 = tpu.dynamic_rotate %58 by %c239_i32_33 dim 1 : vector<4x256xf32>, i32 -> vector<4x256xf32>
    %162 = vector.broadcast %22 : vector<1x256xf32> to vector<4x256xf32>
    %163 = arith.addf %161, %162 : vector<4x256xf32>
    %164 = arith.maximumf %160, %163 : vector<4x256xf32>
    %c0_34 = arith.constant 0 : index
    %c0_35 = arith.constant 0 : index
    %c0_36 = arith.constant 0 : index
    %165 = vector.load %arg3[%c0_34, %c0_35, %c0_36] : memref<3x64x4xf32, #tpu.memory_space<vmem>>, vector<1x64x4xf32>
    %166 = vector.shape_cast %165 : vector<1x64x4xf32> to vector<64x4xf32>
    %cst_37 = arith.constant dense<0.000000e+00> : vector<64x256xf32>
    %167 = tpu.matmul %166, %130, %cst_37 {dimension_numbers = #tpu.dot_dimension_numbers<[1], [0], [0], [1], [0, 0, 1, 1], [], []>} : vector<64x4xf32>, vector<4x256xf32>, vector<64x256xf32> -> vector<64x256xf32>
    %168 = arith.addf %1, %167 : vector<64x256xf32>
    %c1 = arith.constant 1 : index
    %c0_38 = arith.constant 0 : index
    %c0_39 = arith.constant 0 : index
    %169 = vector.load %arg3[%c1, %c0_38, %c0_39] : memref<3x64x4xf32, #tpu.memory_space<vmem>>, vector<1x64x4xf32>
    %170 = vector.shape_cast %169 : vector<1x64x4xf32> to vector<64x4xf32>
    %cst_40 = arith.constant dense<0.000000e+00> : vector<64x256xf32>
    %171 = tpu.matmul %170, %164, %cst_40 {dimension_numbers = #tpu.dot_dimension_numbers<[1], [0], [0], [1], [0, 0, 1, 1], [], []>} : vector<64x4xf32>, vector<4x256xf32>, vector<64x256xf32> -> vector<64x256xf32>
    %172 = arith.addf %168, %171 : vector<64x256xf32>
    %c2 = arith.constant 2 : index
    %c0_41 = arith.constant 0 : index
    %c0_42 = arith.constant 0 : index
    %173 = vector.load %arg3[%c2, %c0_41, %c0_42] : memref<3x64x4xf32, #tpu.memory_space<vmem>>, vector<1x64x4xf32>
    %174 = vector.shape_cast %173 : vector<1x64x4xf32> to vector<64x4xf32>
    %cst_43 = arith.constant dense<0.000000e+00> : vector<64x256xf32>
    %175 = tpu.matmul %174, %58, %cst_43 {dimension_numbers = #tpu.dot_dimension_numbers<[1], [0], [0], [1], [0, 0, 1, 1], [], []>} : vector<64x4xf32>, vector<4x256xf32>, vector<64x256xf32> -> vector<64x256xf32>
    %176 = arith.addf %172, %175 : vector<64x256xf32>
    %cst_44 = arith.constant dense<0.000000e+00> : vector<64xf32>
    %177 = vector.multi_reduction <add>, %176, %cst_44 [1] : vector<64x256xf32> to vector<64xf32>
    %178 = vector.shape_cast %177 : vector<64xf32> to vector<64x1xf32>
    %cst_45 = arith.constant 2.560000e+02 : f32
    %179 = vector.broadcast %cst_45 : f32 to vector<64x1xf32>
    %180 = arith.divf %178, %179 : vector<64x1xf32>
    %c0_46 = arith.constant 0 : index
    %c0_47 = arith.constant 0 : index
    %181 = vector.load %arg4[%c0_46, %c0_47] : memref<4x64xf32, #tpu.memory_space<vmem>>, vector<4x64xf32>
    %cst_48 = arith.constant dense<0.000000e+00> : vector<4x1xf32>
    %182 = tpu.matmul %181, %180, %cst_48 {dimension_numbers = #tpu.dot_dimension_numbers<[1], [0], [0], [1], [0, 0, 1, 1], [], []>} : vector<4x64xf32>, vector<64x1xf32>, vector<4x1xf32> -> vector<4x1xf32>
    %cst_49 = arith.constant 0.000000e+00 : f32
    %183 = vector.broadcast %cst_49 : f32 to vector<4x1xf32>
    %184 = arith.maximumf %182, %183 : vector<4x1xf32>
    %c0_50 = arith.constant 0 : index
    %c0_51 = arith.constant 0 : index
    %185 = vector.load %arg5[%c0_50, %c0_51] : memref<64x4xf32, #tpu.memory_space<vmem>>, vector<64x4xf32>
    %cst_52 = arith.constant dense<0.000000e+00> : vector<64x1xf32>
    %186 = tpu.matmul %185, %184, %cst_52 {dimension_numbers = #tpu.dot_dimension_numbers<[1], [0], [0], [1], [0, 0, 1, 1], [], []>} : vector<64x4xf32>, vector<4x1xf32>, vector<64x1xf32> -> vector<64x1xf32>
    %187 = arith.negf %186 : vector<64x1xf32>
    %188 = math.exp %187 : vector<64x1xf32>
    %cst_53 = arith.constant 1.000000e+00 : f32
    %189 = vector.broadcast %cst_53 : f32 to vector<64x1xf32>
    %190 = arith.addf %189, %188 : vector<64x1xf32>
    %191 = arith.divf %189, %190 : vector<64x1xf32>
    %192 = vector.broadcast %191 : vector<64x1xf32> to vector<64x256xf32>
    %193 = arith.mulf %176, %192 : vector<64x256xf32>
    %c0_54 = arith.constant 0 : index
    %c0_55 = arith.constant 0 : index
    %c0_56 = arith.constant 0 : index
    %194 = vector.load %arg9[%c0_54, %c0_55, %c0_56] : memref<1x64x256xf32, #tpu.memory_space<vmem>>, vector<1x64x256xf32>
    %195 = vector.shape_cast %194 : vector<1x64x256xf32> to vector<64x256xf32>
    %196 = vector.shape_cast %193 : vector<64x256xf32> to vector<1x64x256xf32>
    tpu.vector_store %arg9[%c0_54, %c0_55, %c0_56], %196 {strides = array<i32>} : memref<1x64x256xf32, #tpu.memory_space<vmem>>, vector<1x64x256xf32>,
    return
  }
  func.func @transform_0(%arg0: i32) -> (i32, i32, i32) {
    %c0_i32 = arith.constant 0 : i32
    %c0_i32_0 = arith.constant 0 : i32
    %c0_i32_1 = arith.constant 0 : i32
    return %arg0, %c0_i32, %c0_i32_0 : i32, i32, i32
  }
  func.func @transform_1(%arg0: i32) -> (i32, i32) {
    %c0_i32 = arith.constant 0 : i32
    %c0_i32_0 = arith.constant 0 : i32
    %c0_i32_1 = arith.constant 0 : i32
    return %c0_i32, %c0_i32_0 : i32, i32
  }
  func.func @transform_2(%arg0: i32) -> (i32, i32, i32) {
    %c0_i32 = arith.constant 0 : i32
    %c0_i32_0 = arith.constant 0 : i32
    %c0_i32_1 = arith.constant 0 : i32
    %c0_i32_2 = arith.constant 0 : i32
    return %c0_i32, %c0_i32_0, %c0_i32_1 : i32, i32, i32
  }
  func.func @transform_3(%arg0: i32) -> (i32, i32) {
    %c0_i32 = arith.constant 0 : i32
    %c0_i32_0 = arith.constant 0 : i32
    %c0_i32_1 = arith.constant 0 : i32
    return %c0_i32, %c0_i32_0 : i32, i32
  }
  func.func @transform_4(%arg0: i32) -> (i32, i32) {
    %c0_i32 = arith.constant 0 : i32
    %c0_i32_0 = arith.constant 0 : i32
    %c0_i32_1 = arith.constant 0 : i32
    return %c0_i32, %c0_i32_0 : i32, i32
  }
  func.func @transform_5(%arg0: i32) -> (i32, i32) {
    %c0_i32 = arith.constant 0 : i32
    %c0_i32_0 = arith.constant 0 : i32
    %c0_i32_1 = arith.constant 0 : i32
    return %c0_i32, %c0_i32_0 : i32, i32
  }
  func.func @transform_6(%arg0: i32) -> (i32, i32) {
    %c0_i32 = arith.constant 0 : i32
    %c0_i32_0 = arith.constant 0 : i32
    %c0_i32_1 = arith.constant 0 : i32
    return %c0_i32, %c0_i32_0 : i32, i32
  }
  func.func @transform_7(%arg0: i32) -> (i32, i32) {
    %c0_i32 = arith.constant 0 : i32
    %c0_i32_0 = arith.constant 0 : i32
    %c0_i32_1 = arith.constant 0 : i32
    return %c0_i32, %c0_i32_0 : i32, i32
  }
  func.func @transform_8(%arg0: i32) -> (i32, i32, i32) {
    %c0_i32 = arith.constant 0 : i32
    %c0_i32_0 = arith.constant 0 : i32
    %c0_i32_1 = arith.constant 0 : i32
    return %arg0, %c0_i32, %c0_i32_0 : i32, i32, i32
  }
}

</mosaic_0001>

<bundles_post_ra>
// kernel: plugin_rf_forward.1
= control target key start
LH: loop header
LB: loop body
LE: loop exit
PB: predicated region body
PF: predicated region fallthrough
CT: control target
= control target key end

     0   :  { %s2118_s27 = smov 0   ;;  %s2993_s0 = inlined_call_operand.vmem [shape: f32[2,64,256], index: 0, kind: input, shape index: {}]   ;;  %s2994_s1 = inlined_call_operand.vmem [shape: f32[4,64], index: 1, kind: input, shape index: {}]   ;;  %s2995_s2 = inlined_call_operand.vmem [shape: f32[3,64,4], index: 2, kind: input, shape index: {}]   ;;  %s2996_s3 = inlined_call_operand.vmem [shape: f32[4,64], index: 3, kind: input, shape index: {}]   ;;  %s2997_s4 = inlined_call_operand.vmem [shape: f32[64,4], index: 4, kind: input, shape index: {}]   ;;  %s2998_s5 = inlined_call_operand.vmem [shape: f32[9,256], index: 5, kind: input, shape index: {}]   ;;  %s2999_s6 = inlined_call_operand.vmem [shape: f32[9,256], index: 6, kind: input, shape index: {}]   ;;  %s3000_s7 = inlined_call_operand.vmem [shape: f32[1,256], index: 7, kind: input, shape index: {}]   ;;  %s3001_s8 = inlined_call_operand.vmem [shape: f32[2,64,256], index: 8, kind: output, shape index: {}]  }
   0x1 LB: > { %s1784_s28 = sadd.s32 4294967295, %s2059_s27   ;;  %p1788_p0 = scmp.ge.s32.totalorder %s2059_s27, 1  ;;  %s2059_s27 = sphi %s2118_s27, %s18_s27  }
   0x2   : > { %p262_p1 = scmp.lt.s32.totalorder %s2059_s27, 3 }
   0x4   : > { %p263_p2 = pnand %p1788_p0, %p262_p1 }
   0x6   : > { %266 = sbr.rel (%p263_p2) target bundleno = 1615 (0x64f), region = 52 }
   0xd   : > { %p296_p3 = scmp.lt.s32.totalorder %s1784_s28, 1  ;;  %v3002_v0 = vmov 0.0   ;;  %v331_v25 = vld [vmem:[%s2994_s1] sm:$0xf]  ;;  %vm332_vm0 = vcmask 523264   ;;  %s2062_s13 = smov 16   ;;  %v411_v28 = vlaneseq }
   0xe   : > { %400 = vmatprep.mubr.f32.mxu0 %v3002_v0  ;;  %1002 = vmatprep.mubr.f32.mxu1 %v3002_v0  ;;  %s2063_s14 = smov 17   ;;  %s2064_s15 = smov 15   ;;  %v2236_v34 = vld [vmem:[%s2999_s6] sm:$0xff]  ;;  %v2245_v38 = vld [vmem:[%s2999_s6 + $0x8] sm:$0xff]  ;;  %vm889_vm9 = vcmask 1043456   ;;  %vm864_vm10 = vcmask 31744  }
   0xf   : > { %s3063_s28 = smov (!%p296_p3, %s1784_s28), 1  ;;  %s2065_s16 = smov 1   ;;  %v417_v29 = vshrl.u32 %v411_v28, 7  ;;  %v2238_v35 = vand.u32 127, %v411_v28  ;;  %v2258_v43 = vld [vmem:[%s2998_s5] sm:$0xff]  ;;  %v2263_v44 = vld [vmem:[%s2998_s5 + $0x8] sm:$0xff] }
  0x10   : > { %s1864_s29 = sshll.u32 %s3063_s28, 7  ;;  %s2066_s17 = smov 127   ;;  %vm2071_vm11 = vmmov 0  }
  0x11   : > { %s2136_s10 = scalar_lea.vmem %s2993_s0, %s1864_s29  ;;  %s2067_s18 = smov 113   ;;  %v2231_v32 = vsub.s32 4, %v417_v29  ;;  %v2240_v36 = vsub.s32 1, %v417_v29  ;;  %v454_v39 = vsub.s32 2, %v417_v29  ;;  %v2247_v40 = vsub.s32 3, %v417_v29 }
  0x12   : > { %v2139_v1 = vld [vmem:[%s2136_s10 + $0x8] sm:$0xff]  ;;  %v2142_v2 = vld [vmem:[%s2136_s10 + $0x18] sm:$0xff]  ;;  %v2145_v3 = vld [vmem:[%s2136_s10] sm:$0xff]  ;;  %s2068_s19 = smov 112   ;;  %s2069_s20 = smov 111   ;;  %v2249_v41 = vsub.s32 0, %v417_v29 }
  0x13   : > { %3023 = vst [vmem:[#allocation2_spill] sm:$0xff] %v2139_v1  ;;  %3024 = vst [vmem:[#allocation3_spill] sm:$0xff] %v2142_v2  ;;  %v1917_v4 = vpack.c.bf16 %v2142_v2, %v2139_v1  ;;  %v2150_v5 = vld [vmem:[%s2136_s10 + $0x10] sm:$0xff]  ;;  %v2153_v6 = vld [vmem:[%s2136_s10 + $0x28] sm:$0xff]  ;;  %v2253_v42 = vrot.slane %v2236_v34, %v2231_v32  ;;  %vm430_vm1 = vcmp.lt.s32.totalorder %v2238_v35, 16  ;;  %v2268_v45 = vrot.slane %v2236_v34, %v2240_v36  ;;  %s2956_s23 = scalar_lea.vmem %s3001_s8, %s1864_s29 }
  0x14   : > { %3025 = vst [vmem:[#allocation4_spill] sm:$0xff] %v2145_v3  ;;  %3026 = vst [vmem:[#allocation5_spill] sm:$0xff] %v2150_v5  ;;  %v2156_v7 = vld [vmem:[%s2136_s10 + $0x38] sm:$0xff]  ;;  %v1919_v8 = vpack.c.bf16 %v2150_v5, %v2145_v3  ;;  %v2163_v10 = vld [vmem:[%s2136_s10 + $0x20] sm:$0xff]  ;;  %v2272_v46 = vrot.slane %v2245_v38, %v2240_v36  ;;  %v2276_v49 = vrot.slane %v2245_v38, %v2231_v32  ;;  %vm449_vm2 = vcmp.lt.s32.totalorder %v2238_v35, 15 }
  0x15   : > { %3027 = vst [vmem:[#allocation6_spill] sm:$0xff] %v2153_v6  ;;  %3028 = vst [vmem:[#allocation7_spill] sm:$0xff] %v2156_v7  ;;  %v1921_v9 = vpack.c.bf16 %v2156_v7, %v2153_v6  ;;  %v2166_v11 = vld [vmem:[%s2136_s10 + $0x30] sm:$0xff]  ;;  %v2169_v12 = vld [vmem:[%s2136_s10 + $0x48] sm:$0xff]  ;;  %1918 = vmatprep.subr.bf16.mxu0 %v1917_v4  ;;  %v2280_v50 = vrot.slane %v2258_v43, %v2240_v36  ;;  %v2284_v51 = vrot.slane %v2263_v44, %v2240_v36 }
  0x16   : > { %3029 = vst [vmem:[#allocation8_spill] sm:$0xff] %v2163_v10  ;;  %3030 = vst [vmem:[#allocation9_spill] sm:$0xff] %v2166_v11  ;;  %v317_v13 = vld [vmem:[%s2136_s10 + $0x58] sm:$0xff]  ;;  %1920 = vmatpush1.bf16.msra.mxu0 %v1919_v8  ;;  %v1923_v14 = vpack.c.bf16 %v2166_v11, %v2163_v10  ;;  %v2176_v16 = vld [vmem:[%s2136_s10 + $0x40] sm:$0xff]  ;;  %v2288_v52 = vrot.slane %v2236_v34, %v454_v39  ;;  %v2291_v53 = vrot.slane %v2245_v38, %v454_v39 }
  0x17   : > { %3031 = vst [vmem:[#allocation10_spill] sm:$0xff] %v2169_v12  ;;  %1922 = vmatprep.subr.bf16.mxu0 %v1921_v9  ;;  %v1925_v15 = vpack.c.bf16 %v317_v13, %v2169_v12  ;;  %3032 = vst [vmem:[#allocation11_spill] sm:$0xff] %v2176_v16  ;;  %v2179_v17 = vld [vmem:[%s2136_s10 + $0x50] sm:$0xff]  ;;  %v319_v18 = vld [vmem:[%s2136_s10 + $0x68] sm:$0xff]  ;;  %v2294_v54 = vrot.slane %v2258_v43, %v454_v39  ;;  %v2297_v55 = vrot.slane %v2263_v44, %v454_v39 }
  0x18   : > { %3033 = vst [vmem:[#allocation12_spill] sm:$0xff] %v2179_v17  ;;  %v321_v19 = vld [vmem:[%s2136_s10 + $0x78] sm:$0xff]  ;;  %v1927_v20 = vpack.c.bf16 %v2179_v17, %v2176_v16  ;;  %v2186_v22 = vld [vmem:[%s2136_s10 + $0x60] sm:$0xff]  ;;  %v320_v23 = vld [vmem:[%s2136_s10 + $0x70] sm:$0xff]  ;;  %vm413_vm3 = vcmp.lt.s32.totalorder %v2238_v35, 17  ;;  %vm468_vm4 = vcmp.lt.s32.totalorder %v2238_v35, 1  ;;  %v2303_v56 = vrot.slane %v2236_v34, %v2247_v40 }
  0x19   : > { %v1929_v21 = vpack.c.bf16 %v321_v19, %v319_v18  ;;  %3034 = vst [vmem:[#allocation13_spill] sm:$0xff] %v2186_v22  ;;  %v1931_v24 = vpack.c.bf16 %v320_v23, %v2186_v22  ;;  %v2307_v57 = vrot.slane %v2236_v34, %v2249_v41  ;;  %v2311_v58 = vrot.slane %v2245_v38, %v2249_v41 }
  0x1a   : > { %1924 = vmatpush1.bf16.msra.mxu0 %v1923_v14  ;;  %v2319_v61 = vrot.slane %v2245_v38, %v2247_v40  ;;  %v2323_v63 = vrot.slane %v2258_v43, %v2249_v41  ;;  %v2327_v8 = vrot.slane %v2263_v44, %v2249_v41  ;;  %vm499_vm5 = vcmp.lt.s32.totalorder %v2238_v35, 127 }
  0x1b   : > { %1926 = vmatprep.subr.bf16.mxu0 %v1925_v15  ;;  %v2340_v19 = vsub.s32 5, %v417_v29  ;;  %vm518_vm6 = vcmp.lt.s32.totalorder %v2238_v35, 113  ;;  %vm537_vm7 = vcmp.lt.s32.totalorder %v2238_v35, 112  ;;  %vm556_vm8 = vcmp.lt.s32.totalorder %v2238_v35, 111  ;;  %v857_v35 = vld [vmem:[%s2995_s2 + $0x8] sm:$0xff] }
  0x1d   : > { %v2362_v22 = vrot.slane %v2236_v34, %v2340_v19 }
  0x1e   : > { %1928 = vmatpush1.bf16.msra.mxu0 %v1927_v20 }
  0x1f   : > { %1930 = vmatprep.subr.bf16.mxu0 %v1929_v21 }
  0x22   : > { %1932 = vmatpush1.bf16.msra.mxu0 %v1931_v24 }
  0x25   : > { %1793 = vmatmul.mubr.msk.f32.vlgmr.msra.gmra.mrb[0].mxu0 %vm332_vm0, %v331_v25 }
  0x26   : > { %960 = vmatprep.mubr.f32.mxu0 %v3002_v0 }
  0xf8   : > { %v2195_v26 = vpop.f32.mrb[0].mxu0 }
  0xf9   : > { %426 = vrot.lane.b32.xlu1 %v2195_v26, %s2062_s13  ;;  %407 = vrot.lane.b32.xlu0 %v2195_v26, %s2063_s14  ;;  %v2201_v27 = vpop.f32.mrb[1].mxu0  ;;  %v491_v14 = vadd.f32 %v2253_v42, %v2195_v26 }
  0xfd   : > { %445 = vrot.lane.b32.xlu0 %v2195_v26, %s2064_s15  ;;  %428 = vrot.lane.b32.xlu1 %v2201_v27, %s2062_s13 }
 0x101   : > { %464 = vrot.lane.b32.xlu0 %v2195_v26, %s2065_s16  ;;  %447 = vrot.lane.b32.xlu1 %v2201_v27, %s2064_s15 }
 0x105   : > { %466 = vrot.lane.b32.xlu1 %v2201_v27, %s2065_s16  ;;  %409 = vrot.lane.b32.xlu0 %v2201_v27, %s2063_s14 }
 0x109   : > { %497 = vrot.lane.b32.xlu1 %v2201_v27, %s2066_s17  ;;  %495 = vrot.lane.b32.xlu0 %v2195_v26, %s2066_s17 }
 0x10d   : > { %516 = vrot.lane.b32.xlu1 %v2201_v27, %s2067_s18  ;;  %514 = vrot.lane.b32.xlu0 %v2195_v26, %s2067_s18 }
 0x111   : > { %535 = vrot.lane.b32.xlu1 %v2201_v27, %s2068_s19  ;;  %533 = vrot.lane.b32.xlu0 %v2195_v26, %s2068_s19 }
 0x115   : > { %554 = vrot.lane.b32.xlu1 %v2201_v27, %s2069_s20  ;;  %552 = vrot.lane.b32.xlu0 %v2195_v26, %s2069_s20 }
 0x16b   : > { %v427_v30 = vpop.permute.xlu1 %426  ;;  %v408_v31 = vpop.permute.xlu0 %407 }
 0x16f   : > { %v446_v33 = vpop.permute.xlu0 %445  ;;  %v429_v37 = vpop.permute.xlu1 %428 }
 0x170   : > { %v431_v59 = vsel %vm430_vm1, %v427_v30, %v429_v37  ;;  %v432_v60 = vsel %vm430_vm1, %v429_v37, %v427_v30  ;;  %v2356_v37 = vsub.s32 7, %v417_v29 }
 0x171   : > { %v441_v20 = vadd.f32 %v2268_v45, %v432_v60  ;;  %v442_v21 = vadd.f32 %v2272_v46, %v431_v59 }
 0x172   : > { %v2414_v10 = vrot.slane %v2245_v38, %v2356_v37 }
 0x173   : > { %v465_v47 = vpop.permute.xlu0 %464  ;;  %v448_v48 = vpop.permute.xlu1 %447 }
 0x174   : > { %v450_v15 = vsel %vm449_vm2, %v446_v33, %v448_v48  ;;  %v451_v18 = vsel %vm449_vm2, %v448_v48, %v446_v33  ;;  %v2354_v33 = vsub.s32 6, %v417_v29  ;;  %3037 = vst [vmem:[#allocation16_spill] sm:$0xff] %v2414_v10 }
 0x175   : > { %v460_v39 = vadd.f32 %v2288_v52, %v451_v18  ;;  %v461_v48 = vadd.f32 %v2291_v53, %v450_v15 }
 0x176   : > { %v2385_v16 = vrot.slane %v2236_v34, %v2354_v33  ;;  %v2389_v7 = vrot.slane %v2245_v38, %v2354_v33 }
 0x177   : > { %v467_v62 = vpop.permute.xlu1 %466  ;;  %v410_v4 = vpop.permute.xlu0 %409 }
 0x178   : > { %v414_v9 = vsel %vm413_vm3, %v408_v31, %v410_v4  ;;  %v415_v13 = vsel %vm413_vm3, %v410_v4, %v408_v31  ;;  %v2348_v25 = vsel %vm468_vm4, %v465_v47, %v467_v62  ;;  %v2352_v28 = vsel %vm468_vm4, %v467_v62, %v465_v47  ;;  %3035 = vst [vmem:[#allocation14_spill] sm:$0xff] %v2389_v7 }
 0x179   : > { %v424_v23 = vadd.f32 %v2307_v57, %v415_v13  ;;  %v425_v24 = vadd.f32 %v2311_v58, %v414_v9  ;;  %v2366_v47 = vrot.slane %v2245_v38, %v2340_v19  ;;  %v492_v62 = vadd.f32 %v2276_v49, %v2201_v27 }
 0x17a   : > { %v479_v29 = vadd.f32 %v2303_v56, %v2352_v28 }
 0x17b   : > { %v498_v30 = vpop.permute.xlu1 %497  ;;  %v496_v31 = vpop.permute.xlu0 %495  ;;  %v443_v4 = vmax.f32 %v424_v23, %v441_v20  ;;  %v444_v0 = vmax.f32 %v425_v24, %v442_v21  ;;  %v480_v20 = vadd.f32 %v2319_v61, %v2348_v25 }
 0x17c   : > { %v2377_v24 = vsel %vm499_vm5, %v496_v31, %v498_v30  ;;  %v2381_v17 = vsel %vm499_vm5, %v498_v30, %v496_v31  ;;  %v579_v30 = vmul.f32 %v2323_v63, %v415_v13  ;;  %v580_v31 = vmul.f32 %v2327_v8, %v414_v9 }
 0x17d   : > { %v462_v21 = vmax.f32 %v443_v4, %v460_v39  ;;  %v463_v23 = vmax.f32 %v444_v0, %v461_v48  ;;  %v2394_v48 = vrot.slane %v2236_v34, %v2356_v37  ;;  %v511_v34 = vadd.f32 %v2366_v47, %v2381_v17 }
 0x17e   : > { %v589_v13 = vmul.f32 %v2280_v50, %v432_v60  ;;  %v590_v9 = vmul.f32 %v2284_v51, %v431_v59 }
 0x17f   : > { %v517_v12 = vpop.permute.xlu1 %516  ;;  %v515_v11 = vpop.permute.xlu0 %514  ;;  %v481_v39 = vmax.f32 %v462_v21, %v479_v29  ;;  %v482_v0 = vmax.f32 %v463_v23, %v480_v20  ;;  %3036 = vst [vmem:[#allocation15_spill] sm:$0xff] %v2394_v48  ;;  %v510_v21 = vadd.f32 %v2362_v22, %v2377_v24 }
 0x180   : > { %v2400_v4 = vsel %vm518_vm6, %v515_v11, %v517_v12  ;;  %v2404_v6 = vsel %vm518_vm6, %v517_v12, %v515_v11  ;;  %v592_v60 = vadd.f32 %v590_v9, %v580_v31 }
 0x181   : > { %v493_v29 = vmax.f32 %v481_v39, %v491_v14  ;;  %v494_v20 = vmax.f32 %v482_v0, %v492_v62  ;;  %v529_v14 = vadd.f32 %v2385_v16, %v2400_v4  ;;  %v530_v62 = vadd.f32 %v2389_v7, %v2404_v6 }
 0x182   : > { %v591_v39 = vadd.f32 %v589_v13, %v579_v30  ;;  %v2427_v0 = vrot.slane %v2258_v43, %v2247_v40  ;;  %v2436_v13 = vld [vmem:[%s2999_s6 + $0x10] ss:$0 sm:$0xff] }
 0x183   : > { %v536_v23 = vpop.permute.xlu1 %535  ;;  %v534_v2 = vpop.permute.xlu0 %533  ;;  %v512_v11 = vmax.f32 %v493_v29, %v510_v21  ;;  %v513_v12 = vmax.f32 %v494_v20, %v511_v34  ;;  %v601_v21 = vmul.f32 %v2294_v54, %v451_v18  ;;  %v602_v34 = vmul.f32 %v2297_v55, %v450_v15  ;;  %3038 = vst [vmem:[#allocation17_spill] sm:$0xff] %v2436_v13 }
 0x184   : > { %v538_v59 = vsel %vm537_vm7, %v534_v2, %v536_v23  ;;  %v539_v38 = vsel %vm537_vm7, %v536_v23, %v534_v2  ;;  %v2441_v2 = vld [vmem:[%s2999_s6 + $0x18] ss:$0 sm:$0xff]  ;;  %v2445_v18 = vrot.slane %v2263_v44, %v2247_v40  ;;  %v2457_v40 = vrot.slane %v2258_v43, %v2231_v32 }
 0x185   : > { %v531_v29 = vmax.f32 %v512_v11, %v529_v14  ;;  %v532_v20 = vmax.f32 %v513_v12, %v530_v62  ;;  %v548_v5 = vadd.f32 %v2394_v48, %v538_v59  ;;  %v549_v30 = vadd.f32 %v2414_v10, %v539_v38  ;;  %3039 = vst [vmem:[#allocation18_spill] sm:$0xff] %v2441_v2 }
 0x186   : > { %v603_v11 = vadd.f32 %v601_v21, %v591_v39  ;;  %v604_v12 = vadd.f32 %v602_v34, %v592_v60  ;;  %v613_v10 = vmul.f32 %v2427_v0, %v2352_v28  ;;  %v614_v48 = vmul.f32 %v2445_v18, %v2348_v25 }
 0x187   : > { %v555_v31 = vpop.permute.xlu1 %554  ;;  %v553_v9 = vpop.permute.xlu0 %552  ;;  %v550_v14 = vmax.f32 %v531_v29, %v548_v5  ;;  %v551_v62 = vmax.f32 %v532_v20, %v549_v30  ;;  %v2463_v39 = vrot.slane %v2263_v44, %v2231_v32  ;;  %v625_v28 = vmul.f32 %v2457_v40, %v2195_v26 }
 0x188   : > { %v557_v15 = vsel %vm556_vm8, %v553_v9, %v555_v31  ;;  %v558_v23 = vsel %vm556_vm8, %v555_v31, %v553_v9  ;;  %v615_v29 = vadd.f32 %v613_v10, %v603_v11  ;;  %v616_v20 = vadd.f32 %v614_v48, %v604_v12  ;;  %v330_v12 = vld [vmem:[%s3000_s7] sm:$0x3] }
 0x189   : > { %v567_v1 = vadd.f32 %v2436_v13, %v557_v15  ;;  %v568_v3 = vadd.f32 %v2441_v2, %v558_v23  ;;  %v2477_v25 = vrot.slane %v2258_v43, %v2340_v19  ;;  %v2493_v48 = vrot.slane %v2258_v43, %v2354_v33 }
 0x18a   : > { %v627_v10 = vadd.f32 %v625_v28, %v615_v29  ;;  %v2503_v30 = vrot.slane %v2258_v43, %v2356_v37  ;;  %v2520_v43 = vld [vmem:[%s2998_s5 + $0x10] ss:$0 sm:$0xff] }
 0x18b   : > { %v2465_v5 = vmax.f32 %v550_v14, %v567_v1  ;;  %v2467_v60 = vmax.f32 %v551_v62, %v568_v3  ;;  %v2481_v1 = vrot.slane %v2263_v44, %v2340_v19  ;;  %v626_v3 = vmul.f32 %v2463_v39, %v2201_v27 }
 0x18c   : > { %v637_v26 = vmul.f32 %v2477_v25, %v2377_v24  ;;  %v2499_v27 = vrot.slane %v2263_v44, %v2354_v33  ;;  %v2507_v24 = vrot.slane %v2263_v44, %v2356_v37  ;;  %v2525_v44 = vld [vmem:[%s2998_s5 + $0x18] ss:$0 sm:$0xff]  ;;  %v661_v9 = vmul.f32 %v2503_v30, %v538_v59 }
 0x18d   : > { %774 = vrot.lane.b32.xlu0 %v2465_v5, %s2063_s14  ;;  %776 = vrot.lane.b32.xlu1 %v2467_v60, %s2063_s14  ;;  %v628_v32 = vadd.f32 %v626_v3, %v616_v20  ;;  %v638_v19 = vmul.f32 %v2481_v1, %v2381_v17  ;;  %v649_v17 = vmul.f32 %v2493_v48, %v2400_v4 }
 0x18e   : > { %v639_v21 = vadd.f32 %v637_v26, %v627_v10  ;;  %v650_v33 = vmul.f32 %v2499_v27, %v2404_v6  ;;  %v662_v11 = vmul.f32 %v2507_v24, %v539_v38  ;;  %v673_v6 = vmul.f32 %v2520_v43, %v557_v15 }
 0x18f   : > { %v640_v34 = vadd.f32 %v638_v19, %v628_v32  ;;  %v674_v4 = vmul.f32 %v2525_v44, %v558_v23  ;;  %v2543_v59 = vrot.slane %v330_v12, %v2249_v41  ;;  %v2546_v38 = vrot.slane %v330_v12, %v2240_v36 }
 0x190   : > { %v651_v31 = vadd.f32 %v649_v17, %v639_v21 }
 0x191   : > { %782 = vrot.lane.b32.xlu0 %v2465_v5, %s2062_s13  ;;  %784 = vrot.lane.b32.xlu1 %v2467_v60, %s2062_s13  ;;  %v652_v37 = vadd.f32 %v650_v33, %v640_v34  ;;  %3040 = vst [vmem:[#allocation19_spill] sm:$0xff] %v2543_v59  ;;  %3041 = vst [vmem:[#allocation20_spill] sm:$0xff] %v2546_v38 }
 0x192   : > { %v663_v14 = vadd.f32 %v661_v9, %v651_v31 }
 0x193   : > { %v664_v62 = vadd.f32 %v662_v11, %v652_v37 }
 0x194   : > { %v675_v15 = vadd.f32 %v673_v6, %v663_v14 }
 0x195   : > { %792 = vrot.lane.b32.xlu0 %v2465_v5, %s2064_s15  ;;  %794 = vrot.lane.b32.xlu1 %v2467_v60, %s2064_s15  ;;  %v676_v23 = vadd.f32 %v674_v4, %v664_v62 }
 0x196   : > { %v2553_v29 = vmul.f32 %v2543_v59, %v675_v15 }
 0x197   : > { %v2556_v20 = vmul.f32 %v2546_v38, %v676_v23 }
 0x199   : > { %802 = vrot.lane.b32.xlu0 %v2465_v5, %s2065_s16  ;;  %804 = vrot.lane.b32.xlu1 %v2467_v60, %s2065_s16 }
 0x19d   : > { %816 = vrot.lane.b32.xlu0 %v2465_v5, %s2066_s17  ;;  %818 = vrot.lane.b32.xlu1 %v2467_v60, %s2066_s17 }
 0x1a1   : > { %826 = vrot.lane.b32.xlu0 %v2465_v5, %s2067_s18  ;;  %828 = vrot.lane.b32.xlu1 %v2467_v60, %s2067_s18 }
 0x1a5   : > { %690 = vrot.lane.b32.xlu0 %v2553_v29, %s2063_s14  ;;  %692 = vrot.lane.b32.xlu1 %v2556_v20, %s2063_s14 }
 0x1a9   : > { %698 = vrot.lane.b32.xlu0 %v2553_v29, %s2062_s13  ;;  %700 = vrot.lane.b32.xlu1 %v2556_v20, %s2062_s13 }
 0x1ad   : > { %708 = vrot.lane.b32.xlu0 %v2553_v29, %s2064_s15  ;;  %710 = vrot.lane.b32.xlu1 %v2556_v20, %s2064_s15 }
 0x1b1   : > { %718 = vrot.lane.b32.xlu0 %v2553_v29, %s2065_s16  ;;  %720 = vrot.lane.b32.xlu1 %v2556_v20, %s2065_s16 }
 0x1b5   : > { %732 = vrot.lane.b32.xlu0 %v2553_v29, %s2066_s17  ;;  %734 = vrot.lane.b32.xlu1 %v2556_v20, %s2066_s17 }
 0x1b9   : > { %742 = vrot.lane.b32.xlu0 %v2553_v29, %s2067_s18  ;;  %744 = vrot.lane.b32.xlu1 %v2556_v20, %s2067_s18 }
 0x1bd   : > { %752 = vrot.lane.b32.xlu0 %v2553_v29, %s2068_s19  ;;  %754 = vrot.lane.b32.xlu1 %v2556_v20, %s2068_s19 }
 0x1c1   : > { %762 = vrot.lane.b32.xlu0 %v2553_v29, %s2069_s20  ;;  %764 = vrot.lane.b32.xlu1 %v2556_v20, %s2069_s20 }
 0x1c5   : > { %836 = vrot.lane.b32.xlu0 %v2465_v5, %s2068_s19  ;;  %838 = vrot.lane.b32.xlu1 %v2467_v60, %s2068_s19 }
 0x1c9   : > { %846 = vrot.lane.b32.xlu0 %v2465_v5, %s2069_s20  ;;  %848 = vrot.lane.b32.xlu1 %v2467_v60, %s2069_s20 }
 0x1ff   : > { %v775_v36 = vpop.permute.xlu0 %774  ;;  %v777_v41 = vpop.permute.xlu1 %776 }
 0x203   : > { %v783_v28 = vpop.permute.xlu0 %782  ;;  %v785_v3 = vpop.permute.xlu1 %784 }
 0x204   : > { %v786_v12 = vsel %vm430_vm1, %v783_v28, %v785_v3  ;;  %v787_v14 = vsel %vm430_vm1, %v785_v3, %v783_v28  ;;  %v778_v28 = vsel %vm413_vm3, %v775_v36, %v777_v41  ;;  %v779_v3 = vsel %vm413_vm3, %v777_v41, %v775_v36 }
 0x205   : > { %v788_v59 = vadd.f32 %v787_v14, %v2268_v45 }
 0x207   : > { %v793_v10 = vpop.permute.xlu0 %792  ;;  %v795_v32 = vpop.permute.xlu1 %794 }
 0x208   : > { %v797_v36 = vsel %vm449_vm2, %v795_v32, %v793_v10 }
 0x20b   : > { %v803_v26 = vpop.permute.xlu0 %802  ;;  %v805_v19 = vpop.permute.xlu1 %804 }
 0x20c   : > { %v806_v41 = vsel %vm468_vm4, %v803_v26, %v805_v19 }
 0x20f   : > { %v2598_v21 = vpop.permute.xlu0 %816  ;;  %v2600_v34 = vpop.permute.xlu1 %818 }
 0x213   : > { %v2602_v17 = vpop.permute.xlu0 %826  ;;  %v2604_v33 = vpop.permute.xlu1 %828 }
 0x217   : > { %v691_v31 = vpop.permute.xlu0 %690  ;;  %v693_v37 = vpop.permute.xlu1 %692 }
 0x218   : > { %v694_v23 = vsel %vm413_vm3, %v691_v31, %v693_v37  ;;  %v695_v2 = vsel %vm413_vm3, %v693_v37, %v691_v31  ;;  %v789_v31 = vadd.f32 %v786_v12, %v2272_v46 }
 0x219   : > { %v696_v37 = vmul.f32 %v695_v2, %v2323_v63  ;;  %v697_v7 = vmul.f32 %v694_v23, %v2327_v8  ;;  %v781_v2 = vadd.f32 %v778_v28, %v2311_v58 }
 0x21b   : > { %v699_v9 = vpop.permute.xlu0 %698  ;;  %v701_v11 = vpop.permute.xlu1 %700 }
 0x21c   : > { %v702_v6 = vsel %vm430_vm1, %v699_v9, %v701_v11  ;;  %v703_v4 = vsel %vm430_vm1, %v701_v11, %v699_v9 }
 0x21d   : > { %v704_v11 = vmul.f32 %v703_v4, %v2280_v50  ;;  %v705_v38 = vmul.f32 %v702_v6, %v2284_v51  ;;  %v796_v6 = vsel %vm449_vm2, %v793_v10, %v795_v32  ;;  %v807_v10 = vsel %vm468_vm4, %v805_v19, %v803_v26 }
 0x21e   : > { %v808_v58 = vadd.f32 %v807_v10, %v2303_v56  ;;  %v728_v19 = vmul.f32 %v2553_v29, %v2457_v40 }
 0x21f   : > { %v709_v62 = vpop.permute.xlu0 %708  ;;  %v711_v15 = vpop.permute.xlu1 %710  ;;  %v706_v63 = vadd.f32 %v704_v11, %v696_v37  ;;  %v707_v8 = vadd.f32 %v705_v38, %v697_v7  ;;  %v798_v7 = vadd.f32 %v797_v36, %v2288_v52  ;;  %v729_v52 = vmul.f32 %v2556_v20, %v2463_v39 }
 0x220   : > { %v712_v13 = vsel %vm449_vm2, %v709_v62, %v711_v15  ;;  %v713_v9 = vsel %vm449_vm2, %v711_v15, %v709_v62  ;;  %v812_v39 = vadd.f32 %v2465_v5, %v2253_v42  ;;  %v813_v20 = vadd.f32 %v2467_v60, %v2276_v49 }
 0x221   : > { %v714_v62 = vmul.f32 %v713_v9, %v2294_v54  ;;  %v715_v50 = vmul.f32 %v712_v13, %v2297_v55  ;;  %v780_v13 = vadd.f32 %v779_v3, %v2307_v57  ;;  %v809_v9 = vadd.f32 %v806_v41, %v2319_v61 }
 0x223   : > { %v719_v4 = vpop.permute.xlu0 %718  ;;  %v721_v51 = vpop.permute.xlu1 %720  ;;  %v716_v32 = vadd.f32 %v714_v62, %v706_v63  ;;  %v717_v12 = vadd.f32 %v715_v50, %v707_v8  ;;  %v790_v38 = vmax.f32 %v780_v13, %v788_v59 }
 0x224   : > { %v722_v45 = vsel %vm468_vm4, %v719_v4, %v721_v51  ;;  %v723_v46 = vsel %vm468_vm4, %v721_v51, %v719_v4 }
 0x225   : > { %v724_v54 = vmul.f32 %v723_v46, %v2427_v0  ;;  %v725_v55 = vmul.f32 %v722_v45, %v2445_v18  ;;  %v799_v0 = vadd.f32 %v796_v6, %v2291_v53  ;;  %v791_v18 = vmax.f32 %v781_v2, %v789_v31 }
 0x226   : > { %v800_v28 = vmax.f32 %v790_v38, %v798_v7 }
 0x227   : > { %v733_v14 = vpop.permute.xlu0 %732  ;;  %v735_v15 = vpop.permute.xlu1 %734  ;;  %v726_v23 = vadd.f32 %v724_v54, %v716_v32  ;;  %v727_v57 = vadd.f32 %v725_v55, %v717_v12  ;;  %v801_v3 = vmax.f32 %v791_v18, %v799_v0 }
 0x228   : > { %v736_v11 = vsel %vm499_vm5, %v733_v14, %v735_v15  ;;  %v737_v26 = vsel %vm499_vm5, %v735_v15, %v733_v14  ;;  %v810_v40 = vmax.f32 %v800_v28, %v808_v58  ;;  %v856_v28 = vld [vmem:[%s2995_s2] sm:$0xff] }
 0x229   : > { %v730_v31 = vadd.f32 %v728_v19, %v726_v23  ;;  %v731_v37 = vadd.f32 %v729_v52, %v727_v57  ;;  %v738_v62 = vmul.f32 %v736_v11, %v2477_v25  ;;  %v739_v50 = vmul.f32 %v737_v26, %v2481_v1  ;;  %v3046_v19 = vld [vmem:[#allocation16_spill] sm:$0xff] }
 0x22a   : > { %v811_v29 = vmax.f32 %v801_v3, %v809_v9  ;;  %v820_v25 = vsel %vm499_vm5, %v2598_v21, %v2600_v34  ;;  %v821_v1 = vsel %vm499_vm5, %v2600_v34, %v2598_v21  ;;  %v814_v63 = vmax.f32 %v810_v40, %v812_v39  ;;  %v3047_v40 = vld [vmem:[#allocation17_spill] sm:$0xff]  ;;  %v3048_v39 = vld [vmem:[#allocation18_spill] sm:$0xff] }
 0x22b   : > { %v743_v53 = vpop.permute.xlu0 %742  ;;  %v745_v59 = vpop.permute.xlu1 %744  ;;  %v822_v54 = vadd.f32 %v820_v25, %v2362_v22  ;;  %v830_v21 = vsel %vm518_vm6, %v2602_v17, %v2604_v33  ;;  %v823_v41 = vadd.f32 %v821_v1, %v2366_v47  ;;  %v3042_v47 = vld [vmem:[#allocation14_spill] sm:$0xff]  ;;  %v858_v25 = vld [vmem:[%s2995_s2 + $0x10] sm:$0xff]  ;;  %v1809_v1 = vld [vmem:[%s2995_s2 + $0x48] sm:$0xff] }
 0x22c   : > { %v746_v56 = vsel %vm518_vm6, %v743_v53, %v745_v59  ;;  %v747_v61 = vsel %vm518_vm6, %v745_v59, %v743_v53  ;;  %v815_v8 = vmax.f32 %v811_v29, %v813_v20  ;;  %v832_v15 = vadd.f32 %v830_v21, %v2385_v16  ;;  %v3045_v16 = vld [vmem:[#allocation15_spill] sm:$0xff]  ;;  %v863_v59 = vld [vmem:[%s2995_s2 + $0x38] sm:$0xff] }
 0x22d   : > { %v748_v4 = vmul.f32 %v746_v56, %v2493_v48  ;;  %v749_v51 = vmul.f32 %v747_v61, %v2499_v27  ;;  %v740_v48 = vadd.f32 %v738_v62, %v730_v31  ;;  %v741_v27 = vadd.f32 %v739_v50, %v731_v37  ;;  %v1827_v21 = vld [vmem:[%s2995_s2 + $0x88] sm:$0xff] }
 0x22e   : > { %v825_v23 = vmax.f32 %v815_v8, %v823_v41  ;;  %v1815_v8 = vld [vmem:[%s2995_s2 + $0x78] sm:$0xff]  ;;  %v1832_v41 = vld [vmem:[%s2995_s2 + $0xb0] sm:$0xff] }
 0x22f   : > { %v753_v6 = vpop.permute.xlu0 %752  ;;  %v755_v36 = vpop.permute.xlu1 %754  ;;  %v750_v34 = vadd.f32 %v748_v4, %v740_v48  ;;  %v751_v55 = vadd.f32 %v749_v51, %v741_v27  ;;  %v3049_v4 = vmov 0.0   ;;  %v861_v48 = vld [vmem:[%s2995_s2 + $0x28] sm:$0xff]  ;;  %v1812_v27 = vld [vmem:[%s2995_s2 + $0x60] sm:$0xff] }
 0x230   : > { %v756_v42 = vsel %vm537_vm7, %v753_v6, %v755_v36  ;;  %v757_v49 = vsel %vm537_vm7, %v755_v36, %v753_v6  ;;  %v1808_v36 = vld [vmem:[%s2995_s2 + $0x40] sm:$0xff] }
 0x231   : > { %v758_v45 = vmul.f32 %v756_v42, %v2503_v30  ;;  %v759_v46 = vmul.f32 %v757_v49, %v2507_v24  ;;  %v831_v30 = vsel %vm518_vm6, %v2604_v33, %v2602_v17  ;;  %v824_v33 = vmax.f32 %v814_v63, %v822_v54  ;;  %v859_v42 = vld [vmem:[%s2995_s2 + $0x18] sm:$0xff]  ;;  %v1814_v63 = vld [vmem:[%s2995_s2 + $0x70] sm:$0xff]  ;;  %v1826_v54 = vld [vmem:[%s2995_s2 + $0x80] sm:$0xff] }
 0x232   : > { %v833_v7 = vadd.f32 %v831_v30, %v3042_v47  ;;  %v1811_v49 = vld [vmem:[%s2995_s2 + $0x58] sm:$0xff] }
 0x233   : > { %v763_v13 = vpop.permute.xlu0 %762  ;;  %v765_v2 = vpop.permute.xlu1 %764  ;;  %v760_v10 = vadd.f32 %v758_v45, %v750_v34  ;;  %v761_v32 = vadd.f32 %v759_v46, %v751_v55  ;;  %v834_v53 = vmax.f32 %v824_v33, %v832_v15  ;;  %v862_v45 = vld [vmem:[%s2995_s2 + $0x30] sm:$0xff]  ;;  %v1813_v46 = vld [vmem:[%s2995_s2 + $0x68] sm:$0xff]  ;;  %v1829_v55 = vld [vmem:[%s2995_s2 + $0x98] sm:$0xff] }
 0x234   : > { %v766_v24 = vsel %vm556_vm8, %v763_v13, %v765_v2  ;;  %v767_v22 = vsel %vm556_vm8, %v765_v2, %v763_v13  ;;  %v835_v3 = vmax.f32 %v825_v23, %v833_v7  ;;  %v1828_v34 = vld [vmem:[%s2995_s2 + $0x90] sm:$0xff]  ;;  %v1830_v13 = vld [vmem:[%s2995_s2 + $0xa0] sm:$0xff]  ;;  %v1831_v2 = vld [vmem:[%s2995_s2 + $0xa8] sm:$0xff] }
 0x235   : > { %v768_v12 = vmul.f32 %v2520_v43, %v766_v24  ;;  %v769_v14 = vmul.f32 %v2525_v44, %v767_v22  ;;  %v3043_v43 = vld [vmem:[#allocation19_spill] sm:$0xff]  ;;  %v3044_v44 = vld [vmem:[#allocation20_spill] sm:$0xff]  ;;  %v1833_v30 = vld [vmem:[%s2995_s2 + $0xb8] sm:$0xff] }
 0x236   : > { %v3050_v23 = vld [vmem:[#allocation4_spill] sm:$0xff] }
 0x237   : > { %v770_v0 = vadd.f32 %v768_v12, %v760_v10  ;;  %v771_v38 = vadd.f32 %v769_v14, %v761_v32  ;;  %v837_v18 = vpop.permute.xlu0 %836  ;;  %v839_v17 = vpop.permute.xlu1 %838 }
 0x238   : > { %v840_v57 = vsel %vm537_vm7, %v837_v18, %v839_v17  ;;  %v841_v58 = vsel %vm537_vm7, %v839_v17, %v837_v18 }
 0x239   : > { %v772_v9 = vmul.f32 %v770_v0, %v3043_v43  ;;  %v773_v11 = vmul.f32 %v771_v38, %v3044_v44  ;;  %v842_v26 = vadd.f32 %v840_v57, %v3045_v16  ;;  %v843_v52 = vadd.f32 %v841_v58, %v3046_v19  ;;  %v3051_v58 = vld [vmem:[#allocation2_spill] sm:$0xff]  ;;  %v3052_v16 = vld [vmem:[#allocation5_spill] sm:$0xff] }
 0x23b   : > { %v847_v56 = vpop.permute.xlu0 %846  ;;  %1798 = vmatprep.subr.msk.mxu0 %vm889_vm9, %v773_v11  ;;  %1945 = vmatprep.subr.msk.mxu1 %vm889_vm9, %v773_v11  ;;  %v849_v61 = vpop.permute.xlu1 %848  ;;  %v844_v31 = vmax.f32 %v834_v53, %v842_v26  ;;  %v845_v50 = vmax.f32 %v835_v3, %v843_v52  ;;  %v3053_v52 = vld [vmem:[#allocation3_spill] sm:$0xff] }
 0x23c   : > { %v850_v37 = vsel %vm556_vm8, %v847_v56, %v849_v61  ;;  %v851_v62 = vsel %vm556_vm8, %v849_v61, %v847_v56  ;;  %1799 = vmatpush1.msk.msra.mxu0 %vm889_vm9, %v772_v9  ;;  %1946 = vmatpush1.msk.msra.mxu1 %vm889_vm9, %v772_v9  ;;  %v3054_v61 = vld [vmem:[#allocation8_spill] sm:$0xff] }
 0x23d   : > { %v852_v29 = vadd.f32 %v3047_v40, %v850_v37  ;;  %v853_v20 = vadd.f32 %v3048_v39, %v851_v62  ;;  %1807 = vmatmul.mubr.msk.f32.vlgmr.msra.gmra.mrb[0].mxu1 %vm864_vm10, %v863_v59  ;;  %1800 = vmatmul.mubr.msk.f32.vlgmr.msra.gmra.mrb[2].mxu0 %vm864_vm10, %v856_v28  ;;  %v3055_v62 = vld [vmem:[#allocation6_spill] sm:$0xff] }
 0x23e   : > { %1128 = vmatprep.mubr.f32.mxu1 %v3049_v4  ;;  %966 = vmatprep.mubr.f32.mxu0 %v3049_v4 }
 0x23f   : > { %v854_v51 = vmax.f32 %v844_v31, %v852_v29  ;;  %v855_v6 = vmax.f32 %v845_v50, %v853_v20 }
 0x241   : > { %1816 = vmatprep.subr.msk.mxu1 %vm889_vm9, %v855_v6  ;;  %1801 = vmatmul.mubr.msk.f32.gmra.mrb[4].mxu0 %vm864_vm10, %v857_v35  ;;  %v3056_v35 = vld [vmem:[#allocation9_spill] sm:$0xff] }
 0x242   : > { %1817 = vmatpush1.msk.msra.mxu1 %vm889_vm9, %v854_v51  ;;  %972 = vmatprep.mubr.f32.mxu0 %v3049_v4 }
 0x243   : > { %1818 = vmatmul.mubr.msk.f32.vlgmr.msra.gmra.mrb[2].mxu1 %vm864_vm10, %v1808_v36  ;;  %1834 = vmatprep.subr.msk.mxu1 %vm889_vm9, %v2467_v60  ;;  %v860_v60 = vld [vmem:[%s2995_s2 + $0x20] sm:$0xff]  ;;  %v3057_v36 = vld [vmem:[#allocation7_spill] sm:$0xff] }
 0x244   : > { %1835 = vmatpush1.msk.msra.mxu1 %vm889_vm9, %v2465_v5  ;;  %1134 = vmatprep.mubr.f32.mxu1 %v3049_v4  ;;  %v1810_v5 = vld [vmem:[%s2995_s2 + $0x50] sm:$0xff] }
 0x245   : > { %1802 = vmatmul.mubr.msk.f32.gmra.mrb[6].mxu0 %vm864_vm10, %v858_v25 }
 0x246   : > { %978 = vmatprep.mubr.f32.mxu0 %v3049_v4 }
 0x247   : > { %1819 = vmatmul.mubr.msk.f32.gmra.mrb[4].mxu1 %vm864_vm10, %v1809_v1 }
 0x248   : > { %1140 = vmatprep.mubr.f32.mxu1 %v3049_v4 }
 0x249   : > { %1803 = vmatmul.mubr.msk.f32.gmra.mrb[8].mxu0 %vm864_vm10, %v859_v42 }
 0x24a   : > { %984 = vmatprep.mubr.f32.mxu0 %v3049_v4 }
 0x24b   : > { %1820 = vmatmul.mubr.msk.f32.gmra.mrb[6].mxu1 %vm864_vm10, %v1810_v5 }
 0x24c   : > { %1146 = vmatprep.mubr.f32.mxu1 %v3049_v4 }
 0x24d   : > { %1804 = vmatmul.mubr.msk.f32.gmra.mrb[10].mxu0 %vm864_vm10, %v860_v60 }
 0x24e   : > { %990 = vmatprep.mubr.f32.mxu0 %v3049_v4 }
 0x24f   : > { %1821 = vmatmul.mubr.msk.f32.gmra.mrb[8].mxu1 %vm864_vm10, %v1811_v49  ;;  %v3058_v49 = vld [vmem:[#allocation11_spill] sm:$0xff] }
 0x250   : > { %1152 = vmatprep.mubr.f32.mxu1 %v3049_v4 }
 0x251   : > { %1805 = vmatmul.mubr.msk.f32.gmra.mrb[12].mxu0 %vm864_vm10, %v861_v48 }
 0x252   : > { %996 = vmatprep.mubr.f32.mxu0 %v3049_v4 }
 0x253   : > { %1822 = vmatmul.mubr.msk.f32.gmra.mrb[10].mxu1 %vm864_vm10, %v1812_v27 }
 0x254   : > { %1158 = vmatprep.mubr.f32.mxu1 %v3049_v4 }
 0x255   : > { %1806 = vmatmul.mubr.msk.f32.gmra.mrb[14].mxu0 %vm864_vm10, %v862_v45  ;;  %v3059_v45 = vld [vmem:[#allocation10_spill] sm:$0xff] }
 0x256   : > { %1900 = vmatprep.mubr.msk.f32.mxu0 %vm2071_vm11, %v3049_v4 }
 0x257   : > { %1823 = vmatmul.mubr.msk.f32.gmra.mrb[12].mxu1 %vm864_vm10, %v1813_v46 }
 0x258   : > { %1164 = vmatprep.mubr.f32.mxu1 %v3049_v4 }
 0x25b   : > { %1824 = vmatmul.mubr.msk.f32.gmra.mrb[14].mxu1 %vm864_vm10, %v1814_v63 }
 0x25c   : > { %1170 = vmatprep.mubr.f32.mxu1 %v3049_v4 }
 0x25f   : > { %1825 = vmatmul.mubr.msk.f32.gmra.mrb[0].mxu1 %vm864_vm10, %v1815_v8 }
 0x260   : > { %1296 = vmatprep.mubr.f32.mxu1 %v3049_v4 }
 0x263   : > { %1836 = vmatmul.mubr.msk.f32.vlgmr.msra.gmra.mrb[2].mxu1 %vm864_vm10, %v1826_v54 }
 0x264   : > { %1302 = vmatprep.mubr.f32.mxu1 %v3049_v4 }
 0x267   : > { %1837 = vmatmul.mubr.msk.f32.gmra.mrb[4].mxu1 %vm864_vm10, %v1827_v21 }
 0x268   : > { %1308 = vmatprep.mubr.f32.mxu1 %v3049_v4 }
 0x26b   : > { %1838 = vmatmul.mubr.msk.f32.gmra.mrb[6].mxu1 %vm864_vm10, %v1828_v34  ;;  %v3060_v34 = vld [vmem:[#allocation12_spill] sm:$0xff] }
 0x26c   : > { %1314 = vmatprep.mubr.f32.mxu1 %v3049_v4 }
 0x26f   : > { %1839 = vmatmul.mubr.msk.f32.gmra.mrb[8].mxu1 %vm864_vm10, %v1829_v55 }
 0x270   : > { %1320 = vmatprep.mubr.f32.mxu1 %v3049_v4 }
 0x273   : > { %1840 = vmatmul.mubr.msk.f32.gmra.mrb[10].mxu1 %vm864_vm10, %v1830_v13 }
 0x274   : > { %1326 = vmatprep.mubr.f32.mxu1 %v3049_v4 }
 0x277   : > { %1841 = vmatmul.mubr.msk.f32.gmra.mrb[12].mxu1 %vm864_vm10, %v1831_v2  ;;  %v2049_v2 = vld [vmem:[%s2136_s10 + $0x58] sm:$0xff] }
 0x278   : > { %1332 = vmatprep.mubr.f32.mxu1 %v3049_v4 }
 0x27b   : > { %1842 = vmatmul.mubr.msk.f32.gmra.mrb[14].mxu1 %vm864_vm10, %v1832_v41 }
 0x27c   : > { %1338 = vmatprep.mubr.f32.mxu1 %v3049_v4 }
 0x27f   : > { %1843 = vmatmul.mubr.msk.f32.gmra.mrb[0].mxu1 %vm864_vm10, %v1833_v30 }
 0x310   : > { %v962_v24 = vpop.f32.mrb[2].mxu0 }
 0x311   : > { %v964_v22 = vpop.f32.mrb[3].mxu0  ;;  %v1009_v57 = vadd.f32 %v962_v24, %v3050_v23 }
 0x312   : > { %v1010_v43 = vadd.f32 %v964_v22, %v3051_v58 }
 0x314   : > { %v968_v10 = vpop.f32.mrb[4].mxu0 }
 0x315   : > { %v970_v32 = vpop.f32.mrb[5].mxu0  ;;  %v1011_v26 = vadd.f32 %v968_v10, %v3052_v16 }
 0x316   : > { %v1012_v53 = vadd.f32 %v970_v32, %v3053_v52  ;;  %v3061_v32 = vld [vmem:[#allocation13_spill] sm:$0xff] }
 0x318   : > { %v974_v12 = vpop.f32.mrb[6].mxu0 }
 0x319   : > { %v976_v14 = vpop.f32.mrb[7].mxu0  ;;  %v1013_v31 = vadd.f32 %v974_v12, %v3054_v61 }
 0x31a   : > { %v1014_v50 = vadd.f32 %v976_v14, %v3055_v62 }
 0x31c   : > { %v980_v15 = vpop.f32.mrb[8].mxu0 }
 0x31d   : > { %v982_v47 = vpop.f32.mrb[9].mxu0  ;;  %v1015_v51 = vadd.f32 %v980_v15, %v3056_v35  ;;  %v2050_v15 = vld [vmem:[%s2136_s10 + $0x68] sm:$0xff] }
 0x31e   : > { %v1016_v25 = vadd.f32 %v982_v47, %v3057_v36 }
 0x320   : > { %v986_v7 = vpop.f32.mrb[10].mxu0 }
 0x321   : > { %v988_v0 = vpop.f32.mrb[11].mxu0  ;;  %v1017_v48 = vadd.f32 %v986_v7, %v3058_v49  ;;  %v1394_v49 = vld [vmem:[%s2996_s3] sm:$0xf] }
 0x322   : > { %v1018_v46 = vadd.f32 %v988_v0, %v3059_v45 }
 0x324   : > { %v992_v38 = vpop.f32.mrb[12].mxu0 }
 0x325   : > { %v994_v18 = vpop.f32.mrb[13].mxu0  ;;  %v1019_v55 = vadd.f32 %v992_v38, %v3060_v34  ;;  %v1472_v34 = vld [vmem:[%s2997_s4 + $0x18] sm:$0xff] }
 0x326   : > { %v1020_v41 = vadd.f32 %v2049_v2, %v994_v18  ;;  %v1474_v2 = vld [vmem:[%s2997_s4 + $0x28] sm:$0xff] }
 0x328   : > { %v998_v17 = vpop.f32.mrb[14].mxu0 }
 0x329   : > { %v1000_v33 = vpop.f32.mrb[15].mxu0  ;;  %v1021_v12 = vadd.f32 %v998_v17, %v3061_v32 }
 0x32a   : > { %v1022_v47 = vadd.f32 %v2050_v15, %v1000_v33 }
 0x336   : > { %v1298_v9 = vpop.f32.mrb[2].mxu1 }
 0x337   : > { %v2850_v44 = vadd.f32 %v1298_v9, %v1009_v57  ;;  %v1300_v11 = vpop.f32.mrb[3].mxu1  ;;  %v2070_v57 = vmov 0.0|0.0  }
 0x338   : > { %v2853_v19 = vadd.f32 %v1300_v11, %v1010_v43  ;;  %1933 = vmatprep.subr.bf16.mxu0 %v2070_v57  ;;  %v2051_v43 = vld [vmem:[%s2136_s10 + $0x70] sm:$0xff]  ;;  %v2052_v11 = vld [vmem:[%s2136_s10 + $0x78] sm:$0xff] }
 0x33a   : > { %v1304_v59 = vpop.f32.mrb[4].mxu1  ;;  %v1361_v28 = vadd.f32 %v2853_v19, %v2850_v44 }
 0x33b   : > { %v2858_v3 = vadd.f32 %v1304_v59, %v1011_v26  ;;  %v1306_v56 = vpop.f32.mrb[5].mxu1 }
 0x33c   : > { %v2861_v37 = vadd.f32 %v1306_v56, %v1012_v53  ;;  %1362 = vadd.xlane.f32.xlu0 %v1361_v28 }
 0x33e   : > { %v1310_v40 = vpop.f32.mrb[6].mxu1  ;;  %v1364_v29 = vadd.f32 %v2861_v37, %v2858_v3 }
 0x33f   : > { %v2866_v39 = vadd.f32 %v1310_v40, %v1013_v31  ;;  %v1312_v20 = vpop.f32.mrb[7].mxu1 }
 0x340   : > { %v2869_v6 = vadd.f32 %v1312_v20, %v1014_v50  ;;  %1365 = vadd.xlane.f32.xlu1 %v1364_v29 }
 0x342   : > { %v1316_v1 = vpop.f32.mrb[8].mxu1  ;;  %v1367_v42 = vadd.f32 %v2869_v6, %v2866_v39 }
 0x343   : > { %v2874_v5 = vadd.f32 %v1316_v1, %v1015_v51  ;;  %v1318_v60 = vpop.f32.mrb[9].mxu1 }
 0x344   : > { %v2877_v27 = vadd.f32 %v1318_v60, %v1016_v25  ;;  %1368 = vadd.xlane.f32.xlu0 %v1367_v42 }
 0x346   : > { %v1322_v63 = vpop.f32.mrb[10].mxu1  ;;  %v1370_v8 = vadd.f32 %v2877_v27, %v2874_v5 }
 0x347   : > { %v2882_v54 = vadd.f32 %v1322_v63, %v1017_v48  ;;  %v1324_v21 = vpop.f32.mrb[11].mxu1  ;;  %v1469_v48 = vld [vmem:[%s2997_s4] sm:$0xff] }
 0x348   : > { %v2885_v13 = vadd.f32 %v1324_v21, %v1018_v46  ;;  %1371 = vadd.xlane.f32.xlu0 %v1370_v8  ;;  %v1470_v8 = vld [vmem:[%s2997_s4 + $0x8] sm:$0xff]  ;;  %v1471_v21 = vld [vmem:[%s2997_s4 + $0x10] sm:$0xff] }
 0x34a   : > { %v1328_v30 = vpop.f32.mrb[12].mxu1  ;;  %v1373_v24 = vadd.f32 %v2885_v13, %v2882_v54 }
 0x34b   : > { %v2890_v22 = vadd.f32 %v1328_v30, %v1019_v55  ;;  %v1330_v10 = vpop.f32.mrb[13].mxu1  ;;  %v1473_v55 = vld [vmem:[%s2997_s4 + $0x20] sm:$0xff]  ;;  %v1476_v30 = vld [vmem:[%s2997_s4 + $0x38] sm:$0xff] }
 0x34c   : > { %v2893_v14 = vadd.f32 %v1330_v10, %v1020_v41  ;;  %1374 = vadd.xlane.f32.xlu1 %v1373_v24  ;;  %v1475_v41 = vld [vmem:[%s2997_s4 + $0x30] sm:$0xff]  ;;  %v2072_v24 = vmov 0  }
 0x34d   : > { %2016 = vset.pattern.permute.xlu0 %v2072_v24  ;;  %2015 = vset.pattern.permute.xlu1 %v2072_v24 }
 0x34e   : > { %v1334_v7 = vpop.f32.mrb[14].mxu1  ;;  %v1376_v0 = vadd.f32 %v2893_v14, %v2890_v22 }
 0x34f   : > { %v2898_v38 = vadd.f32 %v1334_v7, %v1021_v12  ;;  %v1336_v18 = vpop.f32.mrb[15].mxu1 }
 0x350   : > { %v2900_v23 = vadd.f32 %v1336_v18, %v1022_v47  ;;  %1377 = vadd.xlane.f32.xlu0 %v1376_v0 }
 0x352   : > { %v1340_v58 = vpop.f32.mrb[0].mxu1  ;;  %v1379_v17 = vadd.f32 %v2900_v23, %v2898_v38 }
 0x353   : > { %v2905_v9 = vadd.f32 %v2051_v43, %v1340_v58  ;;  %v1342_v33 = vpop.f32.mrb[1].mxu1 }
 0x354   : > { %v2908_v16 = vadd.f32 %v2052_v11, %v1342_v33  ;;  %1380 = vadd.xlane.f32.xlu1 %v1379_v17 }
 0x356   : > { %v1382_v26 = vadd.f32 %v2908_v16, %v2905_v9 }
 0x358   : > { %1383 = vadd.xlane.f32.xlu0 %v1382_v26 }
 0x3c9   : > { %v1363_v52 = vpop.xlane.xlu0 %1362 }
 0x3ca   : > { %v1386_v59 = vmul.f32 0.00390625, %v1363_v52 }
 0x3cd   : > { %v1366_v53 = vpop.xlane.xlu1 %1365 }
 0x3ce   : > { %v1387_v28 = vmul.f32 0.00390625, %v1366_v53 }
 0x3d0   : > { %v1934_v56 = vpack.c.bf16 %v1387_v28, %v1386_v59 }
 0x3d1   : > { %v1369_v61 = vpop.xlane.xlu0 %1368 }
 0x3d2   : > { %1935 = vmatpush3.bf16.msra.mxu0 %v1934_v56  ;;  %v1388_v62 = vmul.f32 0.00390625, %v1369_v61 }
 0x3d3   : > { %1936 = vmatprep.subr.bf16.mxu0 %v2070_v57 }
 0x3d5   : > { %v1372_v31 = vpop.xlane.xlu0 %1371 }
 0x3d6   : > { %v1389_v50 = vmul.f32 0.00390625, %v1372_v31 }
 0x3d8   : > { %v1937_v40 = vpack.c.bf16 %v1389_v50, %v1388_v62 }
 0x3d9   : > { %v1375_v29 = vpop.xlane.xlu1 %1374 }
 0x3da   : > { %1938 = vmatpush3.bf16.msra.mxu0 %v1937_v40  ;;  %v1390_v35 = vmul.f32 0.00390625, %v1375_v29 }
 0x3db   : > { %1939 = vmatprep.subr.bf16.mxu0 %v2070_v57 }
 0x3dd   : > { %v1378_v20 = vpop.xlane.xlu0 %1377 }
 0x3de   : > { %v1391_v51 = vmul.f32 0.00390625, %v1378_v20 }
 0x3e0   : > { %v1940_v36 = vpack.c.bf16 %v1391_v51, %v1390_v35 }
 0x3e1   : > { %v1381_v4 = vpop.xlane.xlu1 %1380 }
 0x3e2   : > { %1941 = vmatpush3.bf16.msra.mxu0 %v1940_v36  ;;  %v1392_v1 = vmul.f32 0.00390625, %v1381_v4 }
 0x3e3   : > { %1942 = vmatprep.subr.bf16.mxu0 %v2070_v57 }
 0x3e5   : > { %v1384_v25 = vpop.xlane.xlu0 %1383 }
 0x3e6   : > { %v1393_v42 = vmul.f32 0.00390625, %v1384_v25 }
 0x3e8   : > { %v1943_v60 = vpack.c.bf16 %v1393_v42, %v1392_v1 }
 0x3ea   : > { %1944 = vmatpush3.bf16.msra.mxu0 %v1943_v60 }
 0x3ed   : > { %1901 = vmatmul.mubr.msk.f32.vlgmr.msra.gmra.mrb[16].mxu0 %vm332_vm0, %v1394_v49 }
 0x3ee   : > { %1905 = vmatprep.mubr.msk.f32.mxu0 %vm864_vm10, %v1469_v48 }
 0x4c0   : > { %v1464_v45 = vpop.f32.mrb[16].mxu0 }
 0x4c1   : > { %v1468_v46 = vmax.f32 %v1464_v45, 0.0  ;;  %v1902_v63 = vpop.f32.mrb[17].mxu0 }
 0x4c3   : > { %1903 = vmatprep.subr.msk.mxu0 %vm889_vm9, %v1468_v46 }
 0x4c4   : > { %1904 = vmatpush3.msk.msra.mxu0 %vm889_vm9, %v1468_v46 }
 0x4c5   : > { %1906 = vmatmul.mubr.msk.f32.vlgmr.msra.gmra.mrb[18].mxu0 %vm864_vm10, %v1470_v8 }
 0x4c6   : > { %1908 = vmatprep.mubr.msk.f32.mxu0 %vm864_vm10, %v1471_v21 }
 0x4c9   : > { %1909 = vmatmul.mubr.msk.f32.gmra.mrb[20].mxu0 %vm864_vm10, %v1472_v34 }
 0x4ca   : > { %1911 = vmatprep.mubr.msk.f32.mxu0 %vm864_vm10, %v1473_v55 }
 0x4cd   : > { %1912 = vmatmul.mubr.msk.f32.gmra.mrb[22].mxu0 %vm864_vm10, %v1474_v2 }
 0x4ce   : > { %1914 = vmatprep.mubr.msk.f32.mxu0 %vm864_vm10, %v1475_v41 }
 0x4d1   : > { %1915 = vmatmul.mubr.msk.f32.gmra.mrb[24].mxu0 %vm864_vm10, %v1476_v30 }
 0x598   : > { %v1907_v10 = vpop.f32.mrb[18].mxu0 }
 0x599   : > { %v1855_v32 = vmul.f32 -1.442695, %v1907_v10  ;;  %v1570_v12 = vpop.f32.mrb[19].mxu0 }
 0x59a   : > { %v1854_v15 = vmul.f32 -1.442695, %v1570_v12 }
 0x59b   : > { %2017 = vpow2.f32 %v1855_v32 }
 0x59c   : > { %2019 = vpow2.f32 %v1854_v15  ;;  %v1910_v47 = vpop.f32.mrb[20].mxu0 }
 0x59d   : > { %v1857_v7 = vmul.f32 -1.442695, %v1910_v47  ;;  %v1580_v0 = vpop.f32.mrb[21].mxu0 }
 0x59e   : > { %v1856_v18 = vmul.f32 -1.442695, %v1580_v0 }
 0x59f   : > { %2021 = vpow2.f32 %v1857_v7 }
 0x5a0   : > { %2023 = vpow2.f32 %v1856_v18  ;;  %v1913_v57 = vpop.f32.mrb[22].mxu0 }
 0x5a1   : > { %v1859_v58 = vmul.f32 -1.442695, %v1913_v57  ;;  %v1590_v17 = vpop.f32.mrb[23].mxu0 }
 0x5a2   : > { %v1858_v43 = vmul.f32 -1.442695, %v1590_v17 }
 0x5a3   : > { %2025 = vpow2.f32 %v1859_v58 }
 0x5a4   : > { %v1916_v33 = vpop.f32.mrb[24].mxu0  ;;  %2027 = vpow2.f32 %v1858_v43 }
 0x5a5   : > { %v2018_v11 = vpop.eup %2017  ;;  %v1600_v26 = vpop.f32.mrb[25].mxu0  ;;  %v1861_v62 = vmul.f32 -1.442695, %v1916_v33 }
 0x5a6   : > { %v2020_v52 = vpop.eup %2019  ;;  %v1634_v53 = vadd.f32 1.0, %v2018_v11  ;;  %v1860_v59 = vmul.f32 -1.442695, %v1600_v26 }
 0x5a7   : > { %v1633_v28 = vadd.f32 1.0, %v2020_v52 }
 0x5a8   : > { %2029 = vrcp.f32 %v1634_v53 }
 0x5a9   : > { %v2022_v56 = vpop.eup %2021  ;;  %2031 = vrcp.f32 %v1633_v28 }
 0x5aa   : > { %v2024_v61 = vpop.eup %2023  ;;  %v1636_v31 = vadd.f32 1.0, %v2022_v56  ;;  %2033 = vpow2.f32 %v1860_v59 }
 0x5ab   : > { %v1635_v40 = vadd.f32 1.0, %v2024_v61 }
 0x5ac   : > { %2035 = vrcp.f32 %v1636_v31 }
 0x5ad   : > { %v2026_v50 = vpop.eup %2025  ;;  %2037 = vpow2.f32 %v1861_v62 }
 0x5ae   : > { %v1638_v29 = vadd.f32 1.0, %v2026_v50  ;;  %v2028_v20 = vpop.eup %2027  ;;  %2039 = vrcp.f32 %v1635_v40 }
 0x5af   : > { %v1637_v4 = vadd.f32 1.0, %v2028_v20 }
 0x5b0   : > { %2041 = vrcp.f32 %v1638_v29 }
 0x5b1   : > { %2043 = vrcp.f32 %v1637_v4 }
 0x5b2   : > { %v2030_v35 = vpop.eup %2029 }
 0x5b3   : > { %v2032_v51 = vpop.eup %2031  ;;  %1664 = vperm.xlu0 %2016, %v2030_v35  }
 0x5b4   : > { %v2034_v36 = vpop.eup %2033  ;;  %1659 = vperm.xlu1 %2015, %v2032_v51  }
 0x5b5   : > { %v1639_v1 = vadd.f32 1.0, %v2034_v36 }
 0x5b6   : > { %v2036_v25 = vpop.eup %2035 }
 0x5b7   : > { %v2038_v42 = vpop.eup %2037  ;;  %2045 = vrcp.f32 %v1639_v1 }
 0x5b8   : > { %1674 = vperm.xlu1 %2015, %v2036_v25   ;;  %v2040_v60 = vpop.eup %2039  ;;  %v1640_v48 = vadd.f32 1.0, %v2038_v42 }
 0x5ba   : > { %v2042_v49 = vpop.eup %2041  ;;  %2047 = vrcp.f32 %v1640_v48 }
 0x5bb   : > { %v2044_v45 = vpop.eup %2043 }
 0x5bc   : > { %1669 = vperm.xlu1 %2015, %v2040_v60  }
 0x5c0   : > { %1684 = vperm.xlu1 %2015, %v2042_v49  }
 0x5c1   : > { %v2046_v46 = vpop.eup %2045 }
 0x5c4   : > { %1679 = vperm.xlu1 %2015, %v2044_v45   ;;  %v2048_v63 = vpop.eup %2047 }
 0x5c8   : > { %1689 = vperm.xlu1 %2015, %v2046_v46  }
 0x5cc   : > { %1694 = vperm.xlu1 %2015, %v2048_v63  }
 0x632   : > { %v1665_v8 = vpop.permute.xlu0 %1664 }
 0x633   : > { %v1699_v21 = vmul.f32 %v2858_v3, %v1665_v8  ;;  %v1700_v34 = vmul.f32 %v2861_v37, %v1665_v8  ;;  %v1660_v55 = vpop.permute.xlu1 %1659 }
 0x634   : > { %v1697_v2 = vmul.f32 %v2850_v44, %v1660_v55  ;;  %v1698_v41 = vmul.f32 %v2853_v19, %v1660_v55 }
 0x635   : > { %1715 = vst [vmem:[%s2956_s23 + $0x10] sm:$0xff] %v1699_v21  ;;  %1716 = vst [vmem:[%s2956_s23 + $0x18] sm:$0xff] %v1700_v34 }
 0x636   : > { %1713 = vst [vmem:[%s2956_s23] sm:$0xff] %v1697_v2  ;;  %1714 = vst [vmem:[%s2956_s23 + $0x8] sm:$0xff] %v1698_v41 }
 0x637   : > { %v1675_v30 = vpop.permute.xlu1 %1674 }
 0x638   : > { %v1703_v24 = vmul.f32 %v2874_v5, %v1675_v30  ;;  %v1704_v3 = vmul.f32 %v2877_v27, %v1675_v30 }
 0x63a   : > { %1719 = vst [vmem:[%s2956_s23 + $0x30] sm:$0xff] %v1703_v24  ;;  %1720 = vst [vmem:[%s2956_s23 + $0x38] sm:$0xff] %v1704_v3 }
 0x63b   : > { %v1670_v37 = vpop.permute.xlu1 %1669 }
 0x63c   : > { %v1701_v44 = vmul.f32 %v2866_v39, %v1670_v37  ;;  %v1702_v19 = vmul.f32 %v2869_v6, %v1670_v37 }
 0x63e   : > { %1717 = vst [vmem:[%s2956_s23 + $0x20] sm:$0xff] %v1701_v44  ;;  %1718 = vst [vmem:[%s2956_s23 + $0x28] sm:$0xff] %v1702_v19 }
 0x63f   : > { %v1685_v10 = vpop.permute.xlu1 %1684 }
 0x640   : > { %v1707_v32 = vmul.f32 %v2890_v22, %v1685_v10  ;;  %v1708_v5 = vmul.f32 %v2893_v14, %v1685_v10 }
 0x642   : > { %1723 = vst [vmem:[%s2956_s23 + $0x50] sm:$0xff] %v1707_v32  ;;  %1724 = vst [vmem:[%s2956_s23 + $0x58] sm:$0xff] %v1708_v5 }
 0x643   : > { %v1680_v27 = vpop.permute.xlu1 %1679 }
 0x644   : > { %v1705_v12 = vmul.f32 %v2882_v54, %v1680_v27  ;;  %v1706_v39 = vmul.f32 %v2885_v13, %v1680_v27 }
 0x646   : > { %1721 = vst [vmem:[%s2956_s23 + $0x40] sm:$0xff] %v1705_v12  ;;  %1722 = vst [vmem:[%s2956_s23 + $0x48] sm:$0xff] %v1706_v39 }
 0x647   : > { %v1690_v6 = vpop.permute.xlu1 %1689 }
 0x648   : > { %v1709_v15 = vmul.f32 %v2898_v38, %v1690_v6  ;;  %v1710_v47 = vmul.f32 %v2900_v23, %v1690_v6 }
 0x64a   : > { %1725 = vst [vmem:[%s2956_s23 + $0x60] sm:$0xff] %v1709_v15  ;;  %1726 = vst [vmem:[%s2956_s23 + $0x68] sm:$0xff] %v1710_v47 }
 0x64b   : > { %v1695_v22 = vpop.permute.xlu1 %1694 }
 0x64c   : > { %v1711_v14 = vmul.f32 %v2905_v9, %v1695_v22  ;;  %v1712_v7 = vmul.f32 %v2908_v16, %v1695_v22 }
 0x64e   : > { %1727 = vst [vmem:[%s2956_s23 + $0x70] sm:$0xff] %v1711_v14  ;;  %1728 = vst [vmem:[%s2956_s23 + $0x78] sm:$0xff] %v1712_v7 }
 0x64f PF: > { %s18_s27 = sadd.s32 1, %s2059_s27  }
 0x650   : > { %p15_p4 = scmp.ge.s32.totalorder %s18_s27, 4  }
 0x652   :  { %17 = sbr.rel (!%p15_p4) target bundleno = 1 (0x1), region = 84 }

</bundles_post_ra>
